<compile_context>
chip_gen: v6e
topology: v6e:2x2x1
jax: 0.10.0
libtpu: 0.0.40
codegen_flags: <defaults>
</compile_context>

<pallas_src>
import functools

import jax
import jax.numpy as jnp
from jax.experimental import pallas as pl
from jax.experimental.pallas import tpu as pltpu

NUM_ACTIONS = 7
SEMI = 64              # image_embedding_size == semi_memory_size for 7x7 obs
MEM = 2 * SEMI         # 128 = [h | c]
BP = 8                 # batch padded to one full sublane group (B <= 8)
HEAD_LANES = 8         # packed head output: [logits (7) | value (1)]


def _sigmoid(x):
    # 0.5*tanh(0.5x)+0.5: tanh goes to the EUP slot (free alongside VPU work),
    # avoiding the 1/(1+exp(-x)) VALU divide.
    return 0.5 * jnp.tanh(0.5 * x) + 0.5


# ---------------------------------------------------------------------------
# Fused Pallas kernel: conv stack + LSTM cell + actor/critic heads, T steps/call
# ---------------------------------------------------------------------------
def _ac_forward_kernel(p1_ref, mem_ref,
                       c1w_ref, c1b_ref, c2w_ref, c2b_ref, c3w_ref, c3b_ref,
                       lw_ref, lb_ref, h1w_ref, h1b_ref, h2w_ref, h2b_ref,
                       out_ref, mem_out_ref, hc_ref, *, num_actions):
    t = pl.program_id(0)
    f32, bf16 = jnp.float32, jnp.bfloat16

    @pl.when(t == 0)
    def _():
        hc_ref[...] = mem_ref[...]          # initialize the recurrent carry

    # ---- conv1 (2x2, 3->16) + ReLU: one MXU pass over all 36 output positions.
    #      p1 rows are (i, j, 8-padded batch); columns are (di, dj, cin).
    y1 = jnp.dot(p1_ref[...].astype(bf16), c1w_ref[...],
                 preferred_element_type=f32) + c1b_ref[...]
    y1 = jnp.maximum(y1, 0.0)               # (36*BP, 16)

    def conv1_at(i, j):                     # sublane-aligned (BP, 16) batch slab
        pos = i * 6 + j
        return y1[pos * BP:(pos + 1) * BP, :]

    # ---- fused 2x2 max-pool (6x6 -> 3x3), kept entirely in registers.
    pooled = [[jnp.maximum(
                   jnp.maximum(conv1_at(2 * pi, 2 * pj), conv1_at(2 * pi, 2 * pj + 1)),
                   jnp.maximum(conv1_at(2 * pi + 1, 2 * pj), conv1_at(2 * pi + 1, 2 * pj + 1)))
               for pj in range(3)] for pi in range(3)]

    # ---- conv2 (2x2, 16->32) + ReLU; im2col assembled as a register value:
    #      rows (qi, qj, BP), cols (di, dj, cin) -> (4*BP, 64).
    p2 = jnp.concatenate(
        [jnp.concatenate([pooled[qi + di][qj + dj]
                          for di in range(2) for dj in range(2)], axis=1)
         for qi in range(2) for qj in range(2)], axis=0)
    y2 = jnp.dot(p2.astype(bf16), c2w_ref[...],
                 preferred_element_type=f32) + c2b_ref[...]
    y2 = jnp.maximum(y2, 0.0)               # (4*BP, 32)

    # ---- conv3 (2x2, 32->64) + ReLU; lane-dense K = 128, single output position.
    p3 = jnp.concatenate([y2[q * BP:(q + 1) * BP, :] for q in range(4)], axis=1)
    x = jnp.dot(p3.astype(bf16), c3w_ref[...],
                preferred_element_type=f32) + c3b_ref[...]
    x = jnp.maximum(x, 0.0)                 # (BP, 64); NCHW flatten is identity at 1x1

    # ---- LSTMCell: single fused gate matmul [x | h] @ [[W_ih]; [W_hh]].
    h = hc_ref[:, 0:SEMI]
    c = hc_ref[:, SEMI:MEM]
    xh = jnp.concatenate([x, h], axis=1)    # (BP, 128): fills the MXU K depth
    gates = (jnp.dot(xh.astype(bf16), lw_ref[...], preferred_element_type=f32)
             + lb_ref[...])                 # (BP, 256), gate columns [i|f|g|o]
    i_g = _sigmoid(gates[:, 0:SEMI])
    f_g = _sigmoid(gates[:, SEMI:2 * SEMI])
    g_g = jnp.tanh(gates[:, 2 * SEMI:3 * SEMI])
    o_g = _sigmoid(gates[:, 3 * SEMI:4 * SEMI])
    c_new = f_g * c + i_g * g_g
    h_new = o_g * jnp.tanh(c_new)
    hc_new = jnp.concatenate([h_new, c_new], axis=1)   # full 128-lane write
    hc_ref[...] = hc_new

    @pl.when(t == pl.num_programs(0) - 1)
    def _():
        mem_out_ref[...] = hc_new           # final memory only, written once

    # ---- actor/critic heads, packed.
    #      hid = [actor_hidden | critic_hidden] (BP, 128)
    #      raw = [actor_logits (0..A-1) | value (lane A)] (BP, 8)
    hid = jnp.tanh(jnp.dot(h_new.astype(bf16), h1w_ref[...],
                           preferred_element_type=f32) + h1b_ref[...])
    raw = jnp.dot(hid.astype(bf16), h2w_ref[...],
                  preferred_element_type=f32) + h2b_ref[...]
    lane = jax.lax.broadcasted_iota(jnp.int32, raw.shape, 1)
    is_logit = lane < num_actions
    m = jnp.max(jnp.where(is_logit, raw, -jnp.inf), axis=-1, keepdims=True)
    z = raw - m
    lse = jnp.log(jnp.sum(jnp.where(is_logit, jnp.exp(z), 0.0), axis=-1, keepdims=True))
    res = jnp.where(is_logit, z - lse, jnp.where(lane == num_actions, raw, 0.0))
    # lane-dense (BP, 128) store: log-probs in lanes 0..A-1, value in lane A, zeros after
    out_ref[...] = jnp.concatenate(
        [res, jnp.zeros((BP, 128 - HEAD_LANES), f32)], axis=1)


# ---------------------------------------------------------------------------
# Wrapper (only the conv1 im2col / batch padding of the raw image is wrapper XLA)
# ---------------------------------------------------------------------------
def _conv1_patches(images):
    """(T, B, 7, 7, 3) NHWC -> (T, 36*BP, 12) conv1 im2col.
    Rows ordered (i, j, batch padded to BP=8) so every in-kernel slice is sublane
    aligned; columns ordered (di, dj, cin) to match the packed conv weights."""
    T, B, H, W, C = images.shape
    Ho, Wo = H - 1, W - 1
    parts = [images[:, :, di:di + Ho, dj:dj + Wo, :]
             for di in range(2) for dj in range(2)]
    p = jnp.concatenate(parts, axis=-1)                 # (T, B, Ho, Wo, 4C)
    p = jnp.transpose(p, (0, 2, 3, 1, 4))               # (T, Ho, Wo, B, 4C)
    p = jnp.pad(p, ((0, 0), (0, 0), (0, 0), (0, BP - B), (0, 0)))
    return p.reshape(T, Ho * Wo * BP, 4 * C)


def ac_model_forward_sequence(params, images_nhwc, memory, *, num_actions=NUM_ACTIONS):
    """Run T recurrent steps in ONE pallas_call (grid=(T,)): weights stay VMEM
    resident across steps (constant index_maps) and the LSTM state lives in a VMEM
    scratch.  images_nhwc: (T, B, 7, 7, 3); memory: (B, 2*SEMI).
    Returns (log_probs (T,B,A), values (T,B), final_memory (B, 2*SEMI))."""
    T, B, H, W, C = images_nhwc.shape
    assert (H, W, C) == (7, 7, 3), "kernel hard-codes the 7x7x3 minigrid geometry"
    assert 1 <= B <= BP, "batch is padded to 8 sublanes inside the kernel"
    assert num_actions + 1 <= HEAD_LANES

    patches = _conv1_patches(images_nhwc)                                    # (T, 288, 12)
    mem_pad = jnp.pad(memory.astype(jnp.float32), ((0, BP - B), (0, 0)))     # (BP, 128)

    def _const_spec(arr):            # weight resident across all grid steps
        return pl.BlockSpec(arr.shape, lambda t: (0, 0))

    weights = (params["conv1_w"], params["conv1_b"],
               params["conv2_w"], params["conv2_b"],
               params["conv3_w"], params["conv3_b"],
               params["lstm_w"], params["lstm_b"],
               params["head_w1"], params["head_b1"],
               params["head_w2"], params["head_b2"])

    out, mem_out = pl.pallas_call(
        functools.partial(_ac_forward_kernel, num_actions=num_actions),
        out_shape=(jax.ShapeDtypeStruct((T, BP, 128), jnp.float32),   # per step slab
                   jax.ShapeDtypeStruct((BP, MEM), jnp.float32)),     # final [h | c]
        grid_spec=pltpu.PrefetchScalarGridSpec(
            num_scalar_prefetch=0,
            grid=(T,),
            in_specs=[pl.BlockSpec((None, 36 * BP, 12), lambda t: (t, 0, 0)),
                      pl.BlockSpec((BP, MEM), lambda t: (0, 0))]
                     + [_const_spec(w) for w in weights],
            out_specs=(pl.BlockSpec((None, BP, 128), lambda t: (t, 0, 0)),
                       pl.BlockSpec((BP, MEM), lambda t: (0, 0))),
            scratch_shapes=[pltpu.VMEM((BP, MEM), jnp.float32)]),     # recurrent carry
        # recurrence is serial in t; a 'parallel' leading batch axis only pays off on
        # v7x megacore when batch is scaled up (TODO(synk): gate per generation).
        compiler_params=pltpu.CompilerParams(dimension_semantics=("arbitrary",)),
        # memory updated in place (fully effective when callers donate the buffer)
        input_output_aliases={1: 1},
    )(patches, mem_pad, *weights)

    log_probs = out[:, :B, :num_actions]
    values = out[:, :B, num_actions]
    new_memory = mem_out[:B]
    return log_probs, values, new_memory


def ac_model_forward(params, image_nhwc, memory, *, num_actions=NUM_ACTIONS):
    """Single-step module forward(obs, memory): (log_probs (B,A), value (B,), memory)."""
    lp, v, mem = ac_model_forward_sequence(params, image_nhwc[None], memory,
                                           num_actions=num_actions)
    return lp[0], v[0], mem


# ---------------------------------------------------------------------------
# Parameters (deterministic, synthetic -- mirrors module __init__ shapes, packed)
# ---------------------------------------------------------------------------
def init_ac_params(key, *, n=7, m=7, num_actions=NUM_ACTIONS):
    semi = ((n - 1) // 2 - 2) * ((m - 1) // 2 - 2) * 64      # image_embedding_size
    assert semi == SEMI, "kernel hard-codes the 7x7 obs geometry (semi == 64)"
    ks = jax.random.split(key, 9)
    f32, bf16 = jnp.float32, jnp.bfloat16

    def normal(k, shape, scale=0.1):
        return (scale * jax.random.normal(k, shape, f32)).astype(bf16)

    def linear(k, fan_in, fan_out):
        # init_params with cfg.init_var: normal(0,1), unit-norm per output unit, bias 0
        w = jax.random.normal(k, (fan_in, fan_out), f32)
        w = w / jnp.sqrt(jnp.sum(w * w, axis=0, keepdims=True))
        return w, jnp.zeros((fan_out,), f32)

    # conv weights as (kH*kW*Cin, Cout) im2col matrices, rows ordered (di, dj, cin).
    # NOTE: real PyTorch Conv2d weights (Cout, Cin, kH, kW) must be permuted to
    # (kH, kW, Cin, Cout) before reshaping if they are ever loaded here.
    params = {
        "conv1_w": normal(ks[0], (2 * 2 * 3, 16)),
        "conv1_b": jnp.zeros((1, 16), f32),
        "conv2_w": normal(ks[1], (2 * 2 * 16, 32)),
        "conv2_b": jnp.zeros((1, 32), f32),
        "conv3_w": normal(ks[2], (2 * 2 * 32, 64)),
        "conv3_b": jnp.zeros((1, 64), f32),
        # LSTMCell(semi, semi): single stacked weight [[W_ih]; [W_hh]] (2*semi, 4*semi),
        # gate columns [i | f | g | o]; bias = b_ih + b_hh.
        "lstm_w": jnp.concatenate([normal(ks[3], (semi, 4 * semi)),
                                   normal(ks[4], (semi, 4 * semi))], axis=0),
        "lstm_b": jnp.zeros((1, 4 * semi), f32),
    }

    wa1, ba1 = linear(ks[5], semi, 64)
    wa2, ba2 = linear(ks[6], 64, num_actions)
    wc1, bc1 = linear(ks[7], semi, 64)
    wc2, bc2 = linear(ks[8], 64, 1)

    # packed first head layer: columns [actor_hidden (64) | critic_hidden (64)]
    params["head_w1"] = jnp.concatenate([wa1, wc1], axis=1).astype(bf16)     # (64, 128)
    params["head_b1"] = jnp.concatenate([ba1, bc1])[None, :]                 # (1, 128)
    # packed second layer (128, 8): actor rows -> logit lanes 0..A-1, critic -> lane A
    w2 = jnp.zeros((128, HEAD_LANES), f32)
    w2 = w2.at[0:64, 0:num_actions].set(wa2)
    w2 = w2.at[64:128, num_actions:num_actions + 1].set(wc2)
    b2 = jnp.zeros((HEAD_LANES,), f32)
    b2 = b2.at[0:num_actions].set(ba2)
    b2 = b2.at[num_actions].set(bc2[0])
    params["head_w2"] = w2.astype(bf16)
    params["head_b2"] = b2[None, :]
    return params, semi


# ---------------------------------------------------------------------------
# Pure-XLA reference (same packed bf16 weights & matmul casts) for correctness
# ---------------------------------------------------------------------------
def _reference_forward_sequence(params, images, memory, *, num_actions=NUM_ACTIONS):
    f32, bf16 = jnp.float32, jnp.bfloat16

    def conv2x2_relu(x, w, b):
        Bq, H, W, C = x.shape
        Ho, Wo = H - 1, W - 1
        parts = [x[:, di:di + Ho, dj:dj + Wo, :] for di in range(2) for dj in range(2)]
        patches = jnp.concatenate(parts, axis=-1).reshape(Bq * Ho * Wo, 4 * C)
        y = jnp.dot(patches.astype(bf16), w, preferred_element_type=f32) + b
        return jnp.maximum(y, 0.0).reshape(Bq, Ho, Wo, -1)

    def step(mem, image):
        B = image.shape[0]
        x = conv2x2_relu(image, params["conv1_w"], params["conv1_b"])        # (B,6,6,16)
        x = jnp.max(x.reshape(B, 3, 2, 3, 2, 16), axis=(2, 4))               # (B,3,3,16)
        x = conv2x2_relu(x, params["conv2_w"], params["conv2_b"])            # (B,2,2,32)
        x = conv2x2_relu(x, params["conv3_w"], params["conv3_b"])            # (B,1,1,64)
        x = jnp.transpose(x, (0, 3, 1, 2)).reshape(B, -1)                    # NCHW flatten

        h, c = mem[:, :SEMI], mem[:, SEMI:]
        gates = (jnp.dot(jnp.concatenate([x, h], axis=1).astype(bf16),
                         params["lstm_w"], preferred_element_type=f32)
                 + params["lstm_b"])
        i = _sigmoid(gates[:, 0:SEMI])
        f = _sigmoid(gates[:, SEMI:2 * SEMI])
        g = jnp.tanh(gates[:, 2 * SEMI:3 * SEMI])
        o = _sigmoid(gates[:, 3 * SEMI:4 * SEMI])
        c_new = f * c + i * g
        h_new = o * jnp.tanh(c_new)

        hid = jnp.tanh(jnp.dot(h_new.astype(bf16), params["head_w1"],
                               preferred_element_type=f32) + params["head_b1"])
        raw = jnp.dot(hid.astype(bf16), params["head_w2"],
                      preferred_element_type=f32) + params["head_b2"]
        log_probs = jax.nn.log_softmax(raw[:, :num_actions], axis=-1)
        value = raw[:, num_actions]
        return jnp.concatenate([h_new, c_new], axis=1), (log_probs, value)

    mem_final, (lps, vals) = jax.lax.scan(step, memory, images)
    return lps, vals, mem_final


if __name__ == "__main__":
    key = jax.random.PRNGKey(0)
    k_img, k_mem, k_par = jax.random.split(key, 3)

    B, T, n, m, A = 2, 8, 7, 7, NUM_ACTIONS
    params, semi = init_ac_params(k_par, n=n, m=m, num_actions=A)      # semi == 64

    images = jax.random.uniform(k_img, (T, B, n, m, 3), jnp.float32)   # obs.image per step
    memory = 0.1 * jax.random.normal(k_mem, (B, 2 * semi), jnp.float32)

    # --- single-step forward (the module's forward(obs, memory) semantics) ---
    fwd1 = jax.jit(functools.partial(ac_model_forward, params))
    lp1, v1, mem1 = fwd1(images[0], memory)
    jax.block_until_ready((lp1, v1, mem1))
    assert lp1.shape == (B, A) and v1.shape == (B,) and mem1.shape == (B, 2 * semi)

    # --- T-step rollout in one launch (weights stay VMEM-resident across steps) ---
    fwdT = jax.jit(functools.partial(ac_model_forward_sequence, params))
    lps, vals, memT = fwdT(images, memory)
    jax.block_until_ready((lps, vals, memT))
    assert lps.shape == (T, B, A) and vals.shape == (T, B) and memT.shape == (B, 2 * semi)

    # --- correctness vs. a pure-XLA reference on the same packed bf16 weights ---
    ref1_lp, ref1_v, ref1_mem = _reference_forward_sequence(params, images[:1], memory)
    refT_lp, refT_v, refT_mem = _reference_forward_sequence(params, images, memory)
    tol = dict(rtol=1e-3, atol=1e-3)
    assert bool(jnp.allclose(lp1, ref1_lp[0], **tol))
    assert bool(jnp.allclose(v1, ref1_v[0], **tol))
    assert bool(jnp.allclose(mem1, ref1_mem, **tol))
    assert bool(jnp.allclose(lps, refT_lp, **tol))
    assert bool(jnp.allclose(vals, refT_v, **tol))
    assert bool(jnp.allclose(memT, refT_mem, **tol))

    print("KERNEL_OK")
</pallas_src>

<mosaic_0001>
module attributes {stable_mosaic.version = 11 : i64} {
  func.func @_ac_forward_kernel(%arg0: i32, %arg1: memref<1x288x12xf32, #tpu.memory_space<vmem>>, %arg2: memref<8x128xf32, #tpu.memory_space<vmem>>, %arg3: memref<12x16xbf16, #tpu.memory_space<vmem>>, %arg4: memref<1x16xf32, #tpu.memory_space<vmem>>, %arg5: memref<64x32xbf16, #tpu.memory_space<vmem>>, %arg6: memref<1x32xf32, #tpu.memory_space<vmem>>, %arg7: memref<128x64xbf16, #tpu.memory_space<vmem>>, %arg8: memref<1x64xf32, #tpu.memory_space<vmem>>, %arg9: memref<128x256xbf16, #tpu.memory_space<vmem>>, %arg10: memref<1x256xf32, #tpu.memory_space<vmem>>, %arg11: memref<64x128xbf16, #tpu.memory_space<vmem>>, %arg12: memref<1x128xf32, #tpu.memory_space<vmem>>, %arg13: memref<128x8xbf16, #tpu.memory_space<vmem>>, %arg14: memref<1x8xf32, #tpu.memory_space<vmem>>, %arg15: memref<1x8x128xf32, #tpu.memory_space<vmem>>, %arg16: memref<8x128xf32, #tpu.memory_space<vmem>>, %arg17: memref<8x128xf32, #tpu.memory_space<vmem>>) attributes {dimension_semantics = [#tpu.dimension_semantics<arbitrary>], iteration_bounds = array<i64: 1>, scalar_prefetch = 0 : i64, scratch_operands = 1 : i64, tpu.core_type = #tpu.core_type<tc>, window_params = [{transform_indices = @transform_0, window_bounds = array<i64: 1, 288, 12>}, {pipeline_mode = #tpu.pipeline_mode<synchronous>, transform_indices = @transform_1, window_bounds = array<i64: 8, 128>}, {pipeline_mode = #tpu.pipeline_mode<synchronous>, transform_indices = @transform_2, window_bounds = array<i64: 12, 16>}, {pipeline_mode = #tpu.pipeline_mode<synchronous>, transform_indices = @transform_3, window_bounds = array<i64: 1, 16>}, {pipeline_mode = #tpu.pipeline_mode<synchronous>, transform_indices = @transform_4, window_bounds = array<i64: 64, 32>}, {pipeline_mode = #tpu.pipeline_mode<synchronous>, transform_indices = @transform_5, window_bounds = array<i64: 1, 32>}, {pipeline_mode = #tpu.pipeline_mode<synchronous>, transform_indices = @transform_6, window_bounds = array<i64: 128, 64>}, {pipeline_mode = #tpu.pipeline_mode<synchronous>, transform_indices = @transform_7, window_bounds = array<i64: 1, 64>}, {pipeline_mode = #tpu.pipeline_mode<synchronous>, transform_indices = @transform_8, window_bounds = array<i64: 128, 256>}, {pipeline_mode = #tpu.pipeline_mode<synchronous>, transform_indices = @transform_9, window_bounds = array<i64: 1, 256>}, {pipeline_mode = #tpu.pipeline_mode<synchronous>, transform_indices = @transform_10, window_bounds = array<i64: 64, 128>}, {pipeline_mode = #tpu.pipeline_mode<synchronous>, transform_indices = @transform_11, window_bounds = array<i64: 1, 128>}, {pipeline_mode = #tpu.pipeline_mode<synchronous>, transform_indices = @transform_12, window_bounds = array<i64: 128, 8>}, {pipeline_mode = #tpu.pipeline_mode<synchronous>, transform_indices = @transform_13, window_bounds = array<i64: 1, 8>}, {transform_indices = @transform_14, window_bounds = array<i64: 1, 8, 128>}, {pipeline_mode = #tpu.pipeline_mode<synchronous>, transform_indices = @transform_15, window_bounds = array<i64: 8, 128>}]} {
    %c0_i32 = arith.constant 0 : i32
    %0 = arith.cmpi eq, %arg0, %c0_i32 : i32
    %1 = arith.extui %0 : i1 to i32
    %c0_i32_0 = arith.constant 0 : i32
    %2 = arith.cmpi ne, %1, %c0_i32_0 : i32
    scf.if %2 {
      %c0_61 = arith.constant 0 : index
      %c0_62 = arith.constant 0 : index
      %187 = vector.load %arg2[%c0_61, %c0_62] : memref<8x128xf32, #tpu.memory_space<vmem>>, vector<8x128xf32>
      %c0_63 = arith.constant 0 : index
      %c0_64 = arith.constant 0 : index
      %188 = vector.load %arg17[%c0_63, %c0_64] : memref<8x128xf32, #tpu.memory_space<vmem>>, vector<8x128xf32>
      tpu.vector_store %arg17[%c0_63, %c0_64], %187 {strides = array<i32>} : memref<8x128xf32, #tpu.memory_space<vmem>>, vector<8x128xf32>,
    } else {
    }
    %c0 = arith.constant 0 : index
    %c0_1 = arith.constant 0 : index
    %c0_2 = arith.constant 0 : index
    %3 = vector.load %arg1[%c0, %c0_1, %c0_2] : memref<1x288x12xf32, #tpu.memory_space<vmem>>, vector<1x288x12xf32>
    %4 = vector.shape_cast %3 : vector<1x288x12xf32> to vector<288x12xf32>
    %5 = arith.truncf %4 : vector<288x12xf32> to vector<288x12xbf16>
    %c0_3 = arith.constant 0 : index
    %c0_4 = arith.constant 0 : index
    %6 = vector.load %arg3[%c0_3, %c0_4] : memref<12x16xbf16, #tpu.memory_space<vmem>>, vector<12x16xbf16>
    %cst = arith.constant dense<0.000000e+00> : vector<288x16xf32>
    %7 = tpu.matmul %5, %6, %cst {dimension_numbers = #tpu.dot_dimension_numbers<[1], [0], [0], [1], [0, 0, 1, 1], [], []>} : vector<288x12xbf16>, vector<12x16xbf16>, vector<288x16xf32> -> vector<288x16xf32>
    %c0_5 = arith.constant 0 : index
    %c0_6 = arith.constant 0 : index
    %8 = vector.load %arg4[%c0_5, %c0_6] : memref<1x16xf32, #tpu.memory_space<vmem>>, vector<1x16xf32>
    %9 = vector.broadcast %8 : vector<1x16xf32> to vector<288x16xf32>
    %10 = arith.addf %7, %9 : vector<288x16xf32>
    %cst_7 = arith.constant 0.000000e+00 : f32
    %11 = vector.broadcast %cst_7 : f32 to vector<288x16xf32>
    %12 = arith.maximumf %10, %11 : vector<288x16xf32>
    %13 = vector.extract_strided_slice %12 {offsets = [0, 0], sizes = [8, 16], strides = [1, 1]} : vector<288x16xf32> to vector<8x16xf32>
    %14 = vector.extract_strided_slice %12 {offsets = [8, 0], sizes = [8, 16], strides = [1, 1]} : vector<288x16xf32> to vector<8x16xf32>
    %15 = arith.maximumf %13, %14 : vector<8x16xf32>
    %16 = vector.extract_strided_slice %12 {offsets = [48, 0], sizes = [8, 16], strides = [1, 1]} : vector<288x16xf32> to vector<8x16xf32>
    %17 = vector.extract_strided_slice %12 {offsets = [56, 0], sizes = [8, 16], strides = [1, 1]} : vector<288x16xf32> to vector<8x16xf32>
    %18 = arith.maximumf %16, %17 : vector<8x16xf32>
    %19 = arith.maximumf %15, %18 : vector<8x16xf32>
    %20 = vector.extract_strided_slice %12 {offsets = [16, 0], sizes = [8, 16], strides = [1, 1]} : vector<288x16xf32> to vector<8x16xf32>
    %21 = vector.extract_strided_slice %12 {offsets = [24, 0], sizes = [8, 16], strides = [1, 1]} : vector<288x16xf32> to vector<8x16xf32>
    %22 = arith.maximumf %20, %21 : vector<8x16xf32>
    %23 = vector.extract_strided_slice %12 {offsets = [64, 0], sizes = [8, 16], strides = [1, 1]} : vector<288x16xf32> to vector<8x16xf32>
    %24 = vector.extract_strided_slice %12 {offsets = [72, 0], sizes = [8, 16], strides = [1, 1]} : vector<288x16xf32> to vector<8x16xf32>
    %25 = arith.maximumf %23, %24 : vector<8x16xf32>
    %26 = arith.maximumf %22, %25 : vector<8x16xf32>
    %27 = vector.extract_strided_slice %12 {offsets = [32, 0], sizes = [8, 16], strides = [1, 1]} : vector<288x16xf32> to vector<8x16xf32>
    %28 = vector.extract_strided_slice %12 {offsets = [40, 0], sizes = [8, 16], strides = [1, 1]} : vector<288x16xf32> to vector<8x16xf32>
    %29 = arith.maximumf %27, %28 : vector<8x16xf32>
    %30 = vector.extract_strided_slice %12 {offsets = [80, 0], sizes = [8, 16], strides = [1, 1]} : vector<288x16xf32> to vector<8x16xf32>
    %31 = vector.extract_strided_slice %12 {offsets = [88, 0], sizes = [8, 16], strides = [1, 1]} : vector<288x16xf32> to vector<8x16xf32>
    %32 = arith.maximumf %30, %31 : vector<8x16xf32>
    %33 = arith.maximumf %29, %32 : vector<8x16xf32>
    %34 = vector.extract_strided_slice %12 {offsets = [96, 0], sizes = [8, 16], strides = [1, 1]} : vector<288x16xf32> to vector<8x16xf32>
    %35 = vector.extract_strided_slice %12 {offsets = [104, 0], sizes = [8, 16], strides = [1, 1]} : vector<288x16xf32> to vector<8x16xf32>
    %36 = arith.maximumf %34, %35 : vector<8x16xf32>
    %37 = vector.extract_strided_slice %12 {offsets = [144, 0], sizes = [8, 16], strides = [1, 1]} : vector<288x16xf32> to vector<8x16xf32>
    %38 = vector.extract_strided_slice %12 {offsets = [152, 0], sizes = [8, 16], strides = [1, 1]} : vector<288x16xf32> to vector<8x16xf32>
    %39 = arith.maximumf %37, %38 : vector<8x16xf32>
    %40 = arith.maximumf %36, %39 : vector<8x16xf32>
    %41 = vector.extract_strided_slice %12 {offsets = [112, 0], sizes = [8, 16], strides = [1, 1]} : vector<288x16xf32> to vector<8x16xf32>
    %42 = vector.extract_strided_slice %12 {offsets = [120, 0], sizes = [8, 16], strides = [1, 1]} : vector<288x16xf32> to vector<8x16xf32>
    %43 = arith.maximumf %41, %42 : vector<8x16xf32>
    %44 = vector.extract_strided_slice %12 {offsets = [160, 0], sizes = [8, 16], strides = [1, 1]} : vector<288x16xf32> to vector<8x16xf32>
    %45 = vector.extract_strided_slice %12 {offsets = [168, 0], sizes = [8, 16], strides = [1, 1]} : vector<288x16xf32> to vector<8x16xf32>
    %46 = arith.maximumf %44, %45 : vector<8x16xf32>
    %47 = arith.maximumf %43, %46 : vector<8x16xf32>
    %48 = vector.extract_strided_slice %12 {offsets = [128, 0], sizes = [8, 16], strides = [1, 1]} : vector<288x16xf32> to vector<8x16xf32>
    %49 = vector.extract_strided_slice %12 {offsets = [136, 0], sizes = [8, 16], strides = [1, 1]} : vector<288x16xf32> to vector<8x16xf32>
    %50 = arith.maximumf %48, %49 : vector<8x16xf32>
    %51 = vector.extract_strided_slice %12 {offsets = [176, 0], sizes = [8, 16], strides = [1, 1]} : vector<288x16xf32> to vector<8x16xf32>
    %52 = vector.extract_strided_slice %12 {offsets = [184, 0], sizes = [8, 16], strides = [1, 1]} : vector<288x16xf32> to vector<8x16xf32>
    %53 = arith.maximumf %51, %52 : vector<8x16xf32>
    %54 = arith.maximumf %50, %53 : vector<8x16xf32>
    %55 = vector.extract_strided_slice %12 {offsets = [192, 0], sizes = [8, 16], strides = [1, 1]} : vector<288x16xf32> to vector<8x16xf32>
    %56 = vector.extract_strided_slice %12 {offsets = [200, 0], sizes = [8, 16], strides = [1, 1]} : vector<288x16xf32> to vector<8x16xf32>
    %57 = arith.maximumf %55, %56 : vector<8x16xf32>
    %58 = vector.extract_strided_slice %12 {offsets = [240, 0], sizes = [8, 16], strides = [1, 1]} : vector<288x16xf32> to vector<8x16xf32>
    %59 = vector.extract_strided_slice %12 {offsets = [248, 0], sizes = [8, 16], strides = [1, 1]} : vector<288x16xf32> to vector<8x16xf32>
    %60 = arith.maximumf %58, %59 : vector<8x16xf32>
    %61 = arith.maximumf %57, %60 : vector<8x16xf32>
    %62 = vector.extract_strided_slice %12 {offsets = [208, 0], sizes = [8, 16], strides = [1, 1]} : vector<288x16xf32> to vector<8x16xf32>
    %63 = vector.extract_strided_slice %12 {offsets = [216, 0], sizes = [8, 16], strides = [1, 1]} : vector<288x16xf32> to vector<8x16xf32>
    %64 = arith.maximumf %62, %63 : vector<8x16xf32>
    %65 = vector.extract_strided_slice %12 {offsets = [256, 0], sizes = [8, 16], strides = [1, 1]} : vector<288x16xf32> to vector<8x16xf32>
    %66 = vector.extract_strided_slice %12 {offsets = [264, 0], sizes = [8, 16], strides = [1, 1]} : vector<288x16xf32> to vector<8x16xf32>
    %67 = arith.maximumf %65, %66 : vector<8x16xf32>
    %68 = arith.maximumf %64, %67 : vector<8x16xf32>
    %69 = vector.extract_strided_slice %12 {offsets = [224, 0], sizes = [8, 16], strides = [1, 1]} : vector<288x16xf32> to vector<8x16xf32>
    %70 = vector.extract_strided_slice %12 {offsets = [232, 0], sizes = [8, 16], strides = [1, 1]} : vector<288x16xf32> to vector<8x16xf32>
    %71 = arith.maximumf %69, %70 : vector<8x16xf32>
    %72 = vector.extract_strided_slice %12 {offsets = [272, 0], sizes = [8, 16], strides = [1, 1]} : vector<288x16xf32> to vector<8x16xf32>
    %73 = vector.extract_strided_slice %12 {offsets = [280, 0], sizes = [8, 16], strides = [1, 1]} : vector<288x16xf32> to vector<8x16xf32>
    %74 = arith.maximumf %72, %73 : vector<8x16xf32>
    %75 = arith.maximumf %71, %74 : vector<8x16xf32>
    %76 = tpu.concatenate %19, %26, %40, %47 in 1 : vector<8x16xf32>, vector<8x16xf32>, vector<8x16xf32>, vector<8x16xf32> -> vector<8x64xf32>
    %77 = tpu.concatenate %26, %33, %47, %54 in 1 : vector<8x16xf32>, vector<8x16xf32>, vector<8x16xf32>, vector<8x16xf32> -> vector<8x64xf32>
    %78 = tpu.concatenate %40, %47, %61, %68 in 1 : vector<8x16xf32>, vector<8x16xf32>, vector<8x16xf32>, vector<8x16xf32> -> vector<8x64xf32>
    %79 = tpu.concatenate %47, %54, %68, %75 in 1 : vector<8x16xf32>, vector<8x16xf32>, vector<8x16xf32>, vector<8x16xf32> -> vector<8x64xf32>
    %80 = tpu.concatenate %76, %77, %78, %79 in 0 : vector<8x64xf32>, vector<8x64xf32>, vector<8x64xf32>, vector<8x64xf32> -> vector<32x64xf32>
    %81 = arith.truncf %80 : vector<32x64xf32> to vector<32x64xbf16>
    %c0_8 = arith.constant 0 : index
    %c0_9 = arith.constant 0 : index
    %82 = vector.load %arg5[%c0_8, %c0_9] : memref<64x32xbf16, #tpu.memory_space<vmem>>, vector<64x32xbf16>
    %cst_10 = arith.constant dense<0.000000e+00> : vector<32x32xf32>
    %83 = tpu.matmul %81, %82, %cst_10 {dimension_numbers = #tpu.dot_dimension_numbers<[1], [0], [0], [1], [0, 0, 1, 1], [], []>} : vector<32x64xbf16>, vector<64x32xbf16>, vector<32x32xf32> -> vector<32x32xf32>
    %c0_11 = arith.constant 0 : index
    %c0_12 = arith.constant 0 : index
    %84 = vector.load %arg6[%c0_11, %c0_12] : memref<1x32xf32, #tpu.memory_space<vmem>>, vector<1x32xf32>
    %85 = vector.broadcast %84 : vector<1x32xf32> to vector<32x32xf32>
    %86 = arith.addf %83, %85 : vector<32x32xf32>
    %cst_13 = arith.constant 0.000000e+00 : f32
    %87 = vector.broadcast %cst_13 : f32 to vector<32x32xf32>
    %88 = arith.maximumf %86, %87 : vector<32x32xf32>
    %89 = vector.extract_strided_slice %88 {offsets = [0, 0], sizes = [8, 32], strides = [1, 1]} : vector<32x32xf32> to vector<8x32xf32>
    %90 = vector.extract_strided_slice %88 {offsets = [8, 0], sizes = [8, 32], strides = [1, 1]} : vector<32x32xf32> to vector<8x32xf32>
    %91 = vector.extract_strided_slice %88 {offsets = [16, 0], sizes = [8, 32], strides = [1, 1]} : vector<32x32xf32> to vector<8x32xf32>
    %92 = vector.extract_strided_slice %88 {offsets = [24, 0], sizes = [8, 32], strides = [1, 1]} : vector<32x32xf32> to vector<8x32xf32>
    %93 = tpu.concatenate %89, %90, %91, %92 in 1 : vector<8x32xf32>, vector<8x32xf32>, vector<8x32xf32>, vector<8x32xf32> -> vector<8x128xf32>
    %94 = arith.truncf %93 : vector<8x128xf32> to vector<8x128xbf16>
    %c0_14 = arith.constant 0 : index
    %c0_15 = arith.constant 0 : index
    %95 = vector.load %arg7[%c0_14, %c0_15] : memref<128x64xbf16, #tpu.memory_space<vmem>>, vector<128x64xbf16>
    %cst_16 = arith.constant dense<0.000000e+00> : vector<8x64xf32>
    %96 = tpu.matmul %94, %95, %cst_16 {dimension_numbers = #tpu.dot_dimension_numbers<[1], [0], [0], [1], [0, 0, 1, 1], [], []>} : vector<8x128xbf16>, vector<128x64xbf16>, vector<8x64xf32> -> vector<8x64xf32>
    %c0_17 = arith.constant 0 : index
    %c0_18 = arith.constant 0 : index
    %97 = vector.load %arg8[%c0_17, %c0_18] : memref<1x64xf32, #tpu.memory_space<vmem>>, vector<1x64xf32>
    %98 = vector.broadcast %97 : vector<1x64xf32> to vector<8x64xf32>
    %99 = arith.addf %96, %98 : vector<8x64xf32>
    %cst_19 = arith.constant 0.000000e+00 : f32
    %100 = vector.broadcast %cst_19 : f32 to vector<8x64xf32>
    %101 = arith.maximumf %99, %100 : vector<8x64xf32>
    %c0_20 = arith.constant 0 : index
    %c0_21 = arith.constant 0 : index
    %102 = vector.load %arg17[%c0_20, %c0_21] : memref<8x128xf32, #tpu.memory_space<vmem>>, vector<8x64xf32>
    %c0_22 = arith.constant 0 : index
    %c64 = arith.constant 64 : index
    %103 = vector.load %arg17[%c0_22, %c64] : memref<8x128xf32, #tpu.memory_space<vmem>>, vector<8x64xf32>
    %104 = tpu.concatenate %101, %102 in 1 : vector<8x64xf32>, vector<8x64xf32> -> vector<8x128xf32>
    %105 = arith.truncf %104 : vector<8x128xf32> to vector<8x128xbf16>
    %c0_23 = arith.constant 0 : index
    %c0_24 = arith.constant 0 : index
    %106 = vector.load %arg9[%c0_23, %c0_24] : memref<128x256xbf16, #tpu.memory_space<vmem>>, vector<128x256xbf16>
    %cst_25 = arith.constant dense<0.000000e+00> : vector<8x256xf32>
    %107 = tpu.matmul %105, %106, %cst_25 {dimension_numbers = #tpu.dot_dimension_numbers<[1], [0], [0], [1], [0, 0, 1, 1], [], []>} : vector<8x128xbf16>, vector<128x256xbf16>, vector<8x256xf32> -> vector<8x256xf32>
    %c0_26 = arith.constant 0 : index
    %c0_27 = arith.constant 0 : index
    %108 = vector.load %arg10[%c0_26, %c0_27] : memref<1x256xf32, #tpu.memory_space<vmem>>, vector<1x256xf32>
    %109 = vector.broadcast %108 : vector<1x256xf32> to vector<8x256xf32>
    %110 = arith.addf %107, %109 : vector<8x256xf32>
    %111 = vector.extract_strided_slice %110 {offsets = [0, 0], sizes = [8, 64], strides = [1, 1]} : vector<8x256xf32> to vector<8x64xf32>
    %cst_28 = arith.constant 5.000000e-01 : f32
    %112 = vector.broadcast %cst_28 : f32 to vector<8x64xf32>
    %113 = arith.mulf %112, %111 : vector<8x64xf32>
    %114 = math.tanh %113 : vector<8x64xf32>
    %cst_29 = arith.constant 5.000000e-01 : f32
    %115 = vector.broadcast %cst_29 : f32 to vector<8x64xf32>
    %116 = arith.mulf %115, %114 : vector<8x64xf32>
    %cst_30 = arith.constant 5.000000e-01 : f32
    %117 = vector.broadcast %cst_30 : f32 to vector<8x64xf32>
    %118 = arith.addf %116, %117 : vector<8x64xf32>
    %119 = vector.extract_strided_slice %110 {offsets = [0, 64], sizes = [8, 64], strides = [1, 1]} : vector<8x256xf32> to vector<8x64xf32>
    %cst_31 = arith.constant 5.000000e-01 : f32
    %120 = vector.broadcast %cst_31 : f32 to vector<8x64xf32>
    %121 = arith.mulf %120, %119 : vector<8x64xf32>
    %122 = math.tanh %121 : vector<8x64xf32>
    %cst_32 = arith.constant 5.000000e-01 : f32
    %123 = vector.broadcast %cst_32 : f32 to vector<8x64xf32>
    %124 = arith.mulf %123, %122 : vector<8x64xf32>
    %cst_33 = arith.constant 5.000000e-01 : f32
    %125 = vector.broadcast %cst_33 : f32 to vector<8x64xf32>
    %126 = arith.addf %124, %125 : vector<8x64xf32>
    %127 = vector.extract_strided_slice %110 {offsets = [0, 128], sizes = [8, 64], strides = [1, 1]} : vector<8x256xf32> to vector<8x64xf32>
    %128 = math.tanh %127 : vector<8x64xf32>
    %129 = vector.extract_strided_slice %110 {offsets = [0, 192], sizes = [8, 64], strides = [1, 1]} : vector<8x256xf32> to vector<8x64xf32>
    %cst_34 = arith.constant 5.000000e-01 : f32
    %130 = vector.broadcast %cst_34 : f32 to vector<8x64xf32>
    %131 = arith.mulf %130, %129 : vector<8x64xf32>
    %132 = math.tanh %131 : vector<8x64xf32>
    %cst_35 = arith.constant 5.000000e-01 : f32
    %133 = vector.broadcast %cst_35 : f32 to vector<8x64xf32>
    %134 = arith.mulf %133, %132 : vector<8x64xf32>
    %cst_36 = arith.constant 5.000000e-01 : f32
    %135 = vector.broadcast %cst_36 : f32 to vector<8x64xf32>
    %136 = arith.addf %134, %135 : vector<8x64xf32>
    %137 = arith.mulf %126, %103 : vector<8x64xf32>
    %138 = arith.mulf %118, %128 : vector<8x64xf32>
    %139 = arith.addf %137, %138 : vector<8x64xf32>
    %140 = math.tanh %139 : vector<8x64xf32>
    %141 = arith.mulf %136, %140 : vector<8x64xf32>
    %142 = tpu.concatenate %141, %139 in 1 : vector<8x64xf32>, vector<8x64xf32> -> vector<8x128xf32>
    %c0_37 = arith.constant 0 : index
    %c0_38 = arith.constant 0 : index
    %143 = vector.load %arg17[%c0_37, %c0_38] : memref<8x128xf32, #tpu.memory_space<vmem>>, vector<8x128xf32>
    tpu.vector_store %arg17[%c0_37, %c0_38], %142 {strides = array<i32>} : memref<8x128xf32, #tpu.memory_space<vmem>>, vector<8x128xf32>,
    %c0_i32_39 = arith.constant 0 : i32
    %144 = arith.cmpi eq, %arg0, %c0_i32_39 : i32
    %145 = arith.extui %144 : i1 to i32
    %c0_i32_40 = arith.constant 0 : i32
    %146 = arith.cmpi ne, %145, %c0_i32_40 : i32
    scf.if %146 {
      %c0_61 = arith.constant 0 : index
      %c0_62 = arith.constant 0 : index
      %187 = vector.load %arg16[%c0_61, %c0_62] : memref<8x128xf32, #tpu.memory_space<vmem>>, vector<8x128xf32>
      tpu.vector_store %arg16[%c0_61, %c0_62], %142 {strides = array<i32>} : memref<8x128xf32, #tpu.memory_space<vmem>>, vector<8x128xf32>,
    } else {
    }
    %147 = arith.truncf %141 : vector<8x64xf32> to vector<8x64xbf16>
    %c0_41 = arith.constant 0 : index
    %c0_42 = arith.constant 0 : index
    %148 = vector.load %arg11[%c0_41, %c0_42] : memref<64x128xbf16, #tpu.memory_space<vmem>>, vector<64x128xbf16>
    %cst_43 = arith.constant dense<0.000000e+00> : vector<8x128xf32>
    %149 = tpu.matmul %147, %148, %cst_43 {dimension_numbers = #tpu.dot_dimension_numbers<[1], [0], [0], [1], [0, 0, 1, 1], [], []>} : vector<8x64xbf16>, vector<64x128xbf16>, vector<8x128xf32> -> vector<8x128xf32>
    %c0_44 = arith.constant 0 : index
    %c0_45 = arith.constant 0 : index
    %150 = vector.load %arg12[%c0_44, %c0_45] : memref<1x128xf32, #tpu.memory_space<vmem>>, vector<1x128xf32>
    %151 = vector.broadcast %150 : vector<1x128xf32> to vector<8x128xf32>
    %152 = arith.addf %149, %151 : vector<8x128xf32>
    %153 = math.tanh %152 : vector<8x128xf32>
    %154 = arith.truncf %153 : vector<8x128xf32> to vector<8x128xbf16>
    %c0_46 = arith.constant 0 : index
    %c0_47 = arith.constant 0 : index
    %155 = vector.load %arg13[%c0_46, %c0_47] : memref<128x8xbf16, #tpu.memory_space<vmem>>, vector<128x8xbf16>
    %cst_48 = arith.constant dense<0.000000e+00> : vector<8x8xf32>
    %156 = tpu.matmul %154, %155, %cst_48 {dimension_numbers = #tpu.dot_dimension_numbers<[1], [0], [0], [1], [0, 0, 1, 1], [], []>} : vector<8x128xbf16>, vector<128x8xbf16>, vector<8x8xf32> -> vector<8x8xf32>
    %c0_49 = arith.constant 0 : index
    %c0_50 = arith.constant 0 : index
    %157 = vector.load %arg14[%c0_49, %c0_50] : memref<1x8xf32, #tpu.memory_space<vmem>>, vector<1x8xf32>
    %158 = vector.broadcast %157 : vector<1x8xf32> to vector<8x8xf32>
    %159 = arith.addf %156, %158 : vector<8x8xf32>
    %160 = tpu.iota {dimensions = array<i32: 1>} : vector<8x8xi32>
    %c7_i32 = arith.constant 7 : i32
    %161 = vector.broadcast %c7_i32 : i32 to vector<8x8xi32>
    %162 = arith.cmpi slt, %160, %161 : vector<8x8xi32>
    %cst_51 = arith.constant 0xFF800000 : f32
    %163 = vector.broadcast %cst_51 : f32 to vector<8x8xf32>
    %164 = arith.select %162, %159, %163 : vector<8x8xi1>, vector<8x8xf32>
    %cst_52 = arith.constant dense<0xFF800000> : vector<8xf32>
    %165 = vector.multi_reduction <maximumf>, %164, %cst_52 [1] : vector<8x8xf32> to vector<8xf32>
    %166 = vector.shape_cast %165 : vector<8xf32> to vector<8x1xf32>
    %167 = vector.broadcast %166 : vector<8x1xf32> to vector<8x8xf32>
    %168 = arith.subf %159, %167 : vector<8x8xf32>
    %169 = math.exp %168 : vector<8x8xf32>
    %cst_53 = arith.constant 0.000000e+00 : f32
    %170 = vector.broadcast %cst_53 : f32 to vector<8x8xf32>
    %171 = arith.select %162, %169, %170 : vector<8x8xi1>, vector<8x8xf32>
    %cst_54 = arith.constant dense<0.000000e+00> : vector<8xf32>
    %172 = vector.multi_reduction <add>, %171, %cst_54 [1] : vector<8x8xf32> to vector<8xf32>
    %173 = vector.shape_cast %172 : vector<8xf32> to vector<8x1xf32>
    %174 = math.log %173 : vector<8x1xf32>
    %175 = vector.broadcast %174 : vector<8x1xf32> to vector<8x8xf32>
    %176 = arith.subf %168, %175 : vector<8x8xf32>
    %c7_i32_55 = arith.constant 7 : i32
    %177 = vector.broadcast %c7_i32_55 : i32 to vector<8x8xi32>
    %178 = arith.cmpi eq, %160, %177 : vector<8x8xi32>
    %cst_56 = arith.constant 0.000000e+00 : f32
    %179 = vector.broadcast %cst_56 : f32 to vector<8x8xf32>
    %180 = arith.select %178, %159, %179 : vector<8x8xi1>, vector<8x8xf32>
    %181 = arith.select %162, %176, %180 : vector<8x8xi1>, vector<8x8xf32>
    %cst_57 = arith.constant 0.000000e+00 : f32
    %182 = vector.broadcast %cst_57 : f32 to vector<8x120xf32>
    %183 = tpu.concatenate %181, %182 in 1 : vector<8x8xf32>, vector<8x120xf32> -> vector<8x128xf32>
    %c0_58 = arith.constant 0 : index
    %c0_59 = arith.constant 0 : index
    %c0_60 = arith.constant 0 : index
    %184 = vector.load %arg15[%c0_58, %c0_59, %c0_60] : memref<1x8x128xf32, #tpu.memory_space<vmem>>, vector<1x8x128xf32>
    %185 = vector.shape_cast %184 : vector<1x8x128xf32> to vector<8x128xf32>
    %186 = vector.shape_cast %183 : vector<8x128xf32> to vector<1x8x128xf32>
    tpu.vector_store %arg15[%c0_58, %c0_59, %c0_60], %186 {strides = array<i32>} : memref<1x8x128xf32, #tpu.memory_space<vmem>>, vector<1x8x128xf32>,
    return
  }
  func.func @transform_0(%arg0: i32) -> (i32, i32, i32) {
    %c0_i32 = arith.constant 0 : i32
    %c0_i32_0 = arith.constant 0 : i32
    %c0_i32_1 = arith.constant 0 : i32
    return %arg0, %c0_i32, %c0_i32_0 : i32, i32, i32
  }
  func.func @transform_1(%arg0: i32) -> (i32, i32) {
    %c0_i32 = arith.constant 0 : i32
    %c0_i32_0 = arith.constant 0 : i32
    %c0_i32_1 = arith.constant 0 : i32
    return %c0_i32, %c0_i32_0 : i32, i32
  }
  func.func @transform_2(%arg0: i32) -> (i32, i32) {
    %c0_i32 = arith.constant 0 : i32
    %c0_i32_0 = arith.constant 0 : i32
    %c0_i32_1 = arith.constant 0 : i32
    return %c0_i32, %c0_i32_0 : i32, i32
  }
  func.func @transform_3(%arg0: i32) -> (i32, i32) {
    %c0_i32 = arith.constant 0 : i32
    %c0_i32_0 = arith.constant 0 : i32
    %c0_i32_1 = arith.constant 0 : i32
    return %c0_i32, %c0_i32_0 : i32, i32
  }
  func.func @transform_4(%arg0: i32) -> (i32, i32) {
    %c0_i32 = arith.constant 0 : i32
    %c0_i32_0 = arith.constant 0 : i32
    %c0_i32_1 = arith.constant 0 : i32
    return %c0_i32, %c0_i32_0 : i32, i32
  }
  func.func @transform_5(%arg0: i32) -> (i32, i32) {
    %c0_i32 = arith.constant 0 : i32
    %c0_i32_0 = arith.constant 0 : i32
    %c0_i32_1 = arith.constant 0 : i32
    return %c0_i32, %c0_i32_0 : i32, i32
  }
  func.func @transform_6(%arg0: i32) -> (i32, i32) {
    %c0_i32 = arith.constant 0 : i32
    %c0_i32_0 = arith.constant 0 : i32
    %c0_i32_1 = arith.constant 0 : i32
    return %c0_i32, %c0_i32_0 : i32, i32
  }
  func.func @transform_7(%arg0: i32) -> (i32, i32) {
    %c0_i32 = arith.constant 0 : i32
    %c0_i32_0 = arith.constant 0 : i32
    %c0_i32_1 = arith.constant 0 : i32
    return %c0_i32, %c0_i32_0 : i32, i32
  }
  func.func @transform_8(%arg0: i32) -> (i32, i32) {
    %c0_i32 = arith.constant 0 : i32
    %c0_i32_0 = arith.constant 0 : i32
    %c0_i32_1 = arith.constant 0 : i32
    return %c0_i32, %c0_i32_0 : i32, i32
  }
  func.func @transform_9(%arg0: i32) -> (i32, i32) {
    %c0_i32 = arith.constant 0 : i32
    %c0_i32_0 = arith.constant 0 : i32
    %c0_i32_1 = arith.constant 0 : i32
    return %c0_i32, %c0_i32_0 : i32, i32
  }
  func.func @transform_10(%arg0: i32) -> (i32, i32) {
    %c0_i32 = arith.constant 0 : i32
    %c0_i32_0 = arith.constant 0 : i32
    %c0_i32_1 = arith.constant 0 : i32
    return %c0_i32, %c0_i32_0 : i32, i32
  }
  func.func @transform_11(%arg0: i32) -> (i32, i32) {
    %c0_i32 = arith.constant 0 : i32
    %c0_i32_0 = arith.constant 0 : i32
    %c0_i32_1 = arith.constant 0 : i32
    return %c0_i32, %c0_i32_0 : i32, i32
  }
  func.func @transform_12(%arg0: i32) -> (i32, i32) {
    %c0_i32 = arith.constant 0 : i32
    %c0_i32_0 = arith.constant 0 : i32
    %c0_i32_1 = arith.constant 0 : i32
    return %c0_i32, %c0_i32_0 : i32, i32
  }
  func.func @transform_13(%arg0: i32) -> (i32, i32) {
    %c0_i32 = arith.constant 0 : i32
    %c0_i32_0 = arith.constant 0 : i32
    %c0_i32_1 = arith.constant 0 : i32
    return %c0_i32, %c0_i32_0 : i32, i32
  }
  func.func @transform_14(%arg0: i32) -> (i32, i32, i32) {
    %c0_i32 = arith.constant 0 : i32
    %c0_i32_0 = arith.constant 0 : i32
    %c0_i32_1 = arith.constant 0 : i32
    return %arg0, %c0_i32, %c0_i32_0 : i32, i32, i32
  }
  func.func @transform_15(%arg0: i32) -> (i32, i32) {
    %c0_i32 = arith.constant 0 : i32
    %c0_i32_0 = arith.constant 0 : i32
    %c0_i32_1 = arith.constant 0 : i32
    return %c0_i32, %c0_i32_0 : i32, i32
  }
}

</mosaic_0001>

<bundles_post_ra>
// kernel: ac_model_forward.1
= control target key start
LH: loop header
LB: loop body
LE: loop exit
PB: predicated region body
PF: predicated region fallthrough
CT: control target
= control target key end

     0   :  { %vm179_vm0 = vcmask 1045504   ;;  %vm124_vm1 = vcmask 97280   ;;  %s1446_s17 = smov 32   ;;  %s1447_s20 = smov 48   ;;  %vm435_vm2 = vcmask 130048   ;;  %vm437_vm3 = vcmask 261120   ;;  %s1942_s2 = inlined_call_operand.vmem [shape: bf16[12,16], index: 2, kind: input, shape index: {}]   ;;  %s1943_s0 = inlined_call_operand.vmem [shape: f32[1,288,12], index: 0, kind: input, shape index: {}]   ;;  %s1944_s3 = inlined_call_operand.vmem [shape: f32[1,16], index: 3, kind: input, shape index: {}]   ;;  %s1945_s4 = inlined_call_operand.vmem [shape: bf16[64,32], index: 4, kind: input, shape index: {}]   ;;  %s1946_s6 = inlined_call_operand.vmem [shape: bf16[128,64], index: 6, kind: input, shape index: {}]   ;;  %s1947_s5 = inlined_call_operand.vmem [shape: f32[1,32], index: 5, kind: input, shape index: {}]   ;;  %s1948_s1 = inlined_call_operand.vmem [shape: f32[8,128], index: 1, kind: input, shape index: {}, may-alias: {1,15}]   ;;  %s1949_s8 = inlined_call_operand.vmem [shape: bf16[128,256], index: 8, kind: input, shape index: {}]   ;;  %s1950_s7 = inlined_call_operand.vmem [shape: f32[1,64], index: 7, kind: input, shape index: {}]   ;;  %s1951_s9 = inlined_call_operand.vmem [shape: f32[1,256], index: 9, kind: input, shape index: {}]   ;;  %s1952_s10 = inlined_call_operand.vmem [shape: bf16[64,128], index: 10, kind: input, shape index: {}]   ;;  %s1953_s12 = inlined_call_operand.vmem [shape: bf16[128,8], index: 12, kind: input, shape index: {}]   ;;  %s1954_s11 = inlined_call_operand.vmem [shape: f32[1,128], index: 11, kind: input, shape index: {}]   ;;  %s1955_s13 = inlined_call_operand.vmem [shape: f32[1,8], index: 13, kind: input, shape index: {}]   ;;  %s1956_s15 = inlined_call_operand.vmem [shape: f32[8,128], index: 15, kind: output, shape index: {1}, may-alias: {1,15}]   ;;  %s1957_s14 = inlined_call_operand.vmem [shape: f32[1,8,128], index: 14, kind: output, shape index: {0}]  }
   0x1   :  { %v1382_v0 = vld [vmem:[%s1942_s2] sm:$0x3f]   ;;  %v57_v2 = vld [vmem:[%s1943_s0 + $0x8] sm:$0xff]  ;;  %v58_v3 = vld [vmem:[%s1943_s0 + $0x10] sm:$0xff]  ;;  %vm439_vm4 = vcmask 392192   ;;  %vm523_vm5 = vcmask 523264  }
   0x2   :  { %v56_v1 = vld [vmem:[%s1943_s0] sm:$0xff]  ;;  %1343 = vmatprep.subr.msk.bf16.mxu0 %vm179_vm0, %v1382_v0  ;;  %v181_v4 = vsel %vm179_vm0, %v1382_v0, 0  ;;  %v59_v6 = vld [vmem:[%s1943_s0 + $0x18] sm:$0xff]  ;;  %v61_v8 = vld [vmem:[%s1943_s0 + $0x28] sm:$0xff]  ;;  %vm1449_vm6 = vmmov 0   ;;  %s1451_s16 = smov 96  }
   0x3   :  { %v92_v5 = vpack.c.bf16 %v57_v2, %v56_v1  ;;  %v60_v7 = vld [vmem:[%s1943_s0 + $0x20] sm:$0xff]  ;;  %1242 = vmatpush3.bf16.msra.mxu0 %v181_v4  ;;  %v93_v9 = vpack.c.bf16 %v59_v6, %v58_v3  ;;  %v62_v11 = vld [vmem:[%s1943_s0 + $0x30] sm:$0xff]  ;;  %v63_v12 = vld [vmem:[%s1943_s0 + $0x38] sm:$0xff]  ;;  %vm597_vm7 = vcmask 785408   ;;  %vm1099_vm9 = vcmask 64512  }
   0x4   :  { %v94_v10 = vpack.c.bf16 %v61_v8, %v60_v7  ;;  %v64_v13 = vld [vmem:[%s1943_s0 + $0x40] sm:$0xff]  ;;  %v65_v14 = vld [vmem:[%s1943_s0 + $0x48] sm:$0xff]  ;;  %v95_v15 = vpack.c.bf16 %v63_v12, %v62_v11  ;;  %v66_v17 = vld [vmem:[%s1943_s0 + $0x50] sm:$0xff] }
   0x5   :  { %1243 = vmatprep.mubr.msk.bf16.mxu0 %vm124_vm1, %v92_v5  ;;  %v96_v16 = vpack.c.bf16 %v65_v14, %v64_v13  ;;  %v67_v18 = vld [vmem:[%s1943_s0 + $0x58] sm:$0xff]  ;;  %v68_v19 = vld [vmem:[%s1943_s0 + $0x60] sm:$0xff]  ;;  %v69_v20 = vld [vmem:[%s1943_s0 + $0x68] sm:$0xff] }
   0x6   :  { %1244 = vmatmul.mubr.msk.bf16.vlgmr.msra.gmra.mxu0 %vm124_vm1, %v93_v9  ;;  %v97_v21 = vpack.c.bf16 %v67_v18, %v66_v17  ;;  %v98_v22 = vpack.c.bf16 %v69_v20, %v68_v19  ;;  %v70_v23 = vld [vmem:[%s1943_s0 + $0x70] sm:$0xff]  ;;  %v71_v24 = vld [vmem:[%s1943_s0 + $0x78] sm:$0xff]  ;;  %v72_v25 = vld [vmem:[%s1943_s0 + $0x80] sm:$0xff] }
   0x7   :  { %1247 = vmatprep.mubr.msk.bf16.mxu0 %vm124_vm1, %v94_v10  ;;  %v73_v26 = vld [vmem:[%s1943_s0 + $0x88] sm:$0xff]  ;;  %v99_v27 = vpack.c.bf16 %v71_v24, %v70_v23  ;;  %v74_v29 = vld [vmem:[%s1943_s0 + $0x90] sm:$0xff]  ;;  %v75_v30 = vld [vmem:[%s1943_s0 + $0x98] sm:$0xff] }
   0x8   :  { %v100_v28 = vpack.c.bf16 %v73_v26, %v72_v25  ;;  %v76_v31 = vld [vmem:[%s1943_s0 + $0xa0] sm:$0xff]  ;;  %v77_v32 = vld [vmem:[%s1943_s0 + $0xa8] sm:$0xff]  ;;  %v101_v33 = vpack.c.bf16 %v75_v30, %v74_v29  ;;  %v78_v35 = vld [vmem:[%s1943_s0 + $0xb0] sm:$0xff] }
   0x9   :  { %v102_v34 = vpack.c.bf16 %v77_v32, %v76_v31  ;;  %v79_v36 = vld [vmem:[%s1943_s0 + $0xb8] sm:$0xff]  ;;  %v80_v37 = vld [vmem:[%s1943_s0 + $0xc0] sm:$0xff]  ;;  %v81_v38 = vld [vmem:[%s1943_s0 + $0xc8] sm:$0xff] }
   0xa   :  { %v103_v39 = vpack.c.bf16 %v79_v36, %v78_v35  ;;  %v104_v40 = vpack.c.bf16 %v81_v38, %v80_v37  ;;  %v82_v41 = vld [vmem:[%s1943_s0 + $0xd0] sm:$0xff]  ;;  %v83_v42 = vld [vmem:[%s1943_s0 + $0xd8] sm:$0xff]  ;;  %v84_v43 = vld [vmem:[%s1943_s0 + $0xe0] sm:$0xff] }
   0xb   :  { %v85_v44 = vld [vmem:[%s1943_s0 + $0xe8] sm:$0xff]  ;;  %v105_v45 = vpack.c.bf16 %v83_v42, %v82_v41  ;;  %v86_v47 = vld [vmem:[%s1943_s0 + $0xf0] sm:$0xff]  ;;  %v87_v48 = vld [vmem:[%s1943_s0 + $0xf8] sm:$0xff] }
   0xc   :  { %v106_v46 = vpack.c.bf16 %v85_v44, %v84_v43  ;;  %v88_v49 = vld [vmem:[%s1943_s0 + $0x100] sm:$0xff]  ;;  %v89_v50 = vld [vmem:[%s1943_s0 + $0x108] sm:$0xff]  ;;  %v107_v51 = vpack.c.bf16 %v87_v48, %v86_v47  ;;  %v90_v53 = vld [vmem:[%s1943_s0 + $0x110] sm:$0xff] }
   0xd   :  { %v108_v52 = vpack.c.bf16 %v89_v50, %v88_v49  ;;  %v91_v54 = vld [vmem:[%s1943_s0 + $0x118] sm:$0xff]  ;;  %v1665_v58 = vld [vmem:[%s1944_s3] ss:$0 sm:$0xff]  ;;  %s1445_s0 = smov 16  }
   0xe   :  { %1248 = vmatmul.mubr.msk.bf16.gmra.mxu0 %vm124_vm1, %v95_v15  ;;  %v109_v55 = vpack.c.bf16 %v91_v54, %v90_v53 }
   0xf   :  { %1251 = vmatprep.mubr.msk.bf16.mxu0 %vm124_vm1, %v96_v16 }
  0x16   :  { %1252 = vmatmul.mubr.msk.bf16.gmra.mxu0 %vm124_vm1, %v97_v21 }
  0x17   :  { %1255 = vmatprep.mubr.msk.bf16.mxu0 %vm124_vm1, %v98_v22 }
  0x1e   :  { %1256 = vmatmul.mubr.msk.bf16.gmra.mxu0 %vm124_vm1, %v99_v27 }
  0x1f   :  { %1259 = vmatprep.mubr.msk.bf16.mxu0 %vm124_vm1, %v100_v28 }
  0x26   :  { %1260 = vmatmul.mubr.msk.bf16.gmra.mxu0 %vm124_vm1, %v101_v33 }
  0x27   :  { %1263 = vmatprep.mubr.msk.bf16.mxu0 %vm124_vm1, %v102_v34 }
  0x2e   :  { %1264 = vmatmul.mubr.msk.bf16.gmra.mxu0 %vm124_vm1, %v103_v39 }
  0x2f   :  { %1267 = vmatprep.mubr.msk.bf16.mxu0 %vm124_vm1, %v104_v40 }
  0x36   :  { %1268 = vmatmul.mubr.msk.bf16.gmra.mxu0 %vm124_vm1, %v105_v45 }
  0x37   :  { %1271 = vmatprep.mubr.msk.bf16.mxu0 %vm124_vm1, %v106_v46 }
  0x3e   :  { %1272 = vmatmul.mubr.msk.bf16.gmra.mxu0 %vm124_vm1, %v107_v51 }
  0x3f   :  { %1275 = vmatprep.mubr.msk.bf16.mxu0 %vm124_vm1, %v108_v52 }
  0x46   :  { %1276 = vmatmul.mubr.msk.bf16.gmra.mxu0 %vm124_vm1, %v109_v55 }
  0xc6   :  { %v1245_v56 = vpop.f32.mrf.mxu0 }
  0xc7   :  { %v226_v17 = vadd.f32 %v1245_v56, %v1665_v58 }
  0xc8   :  { %v217_v57 = vpop.f32.mrf.mxu0 }
  0xc9   :  { %v218_v60 = vadd.f32 %v1665_v58, %v217_v57  ;;  %v362_v28 = vmax.f32 %v226_v17, 0.0 }
  0xca   :  { %v1246_v59 = vpop.f32.mrf.mxu0 }
  0xcb   :  { %v360_v0 = vmax.f32 %v218_v60, 0.0  ;;  %v229_v12 = vadd.f32 %v1246_v59, %v1665_v58 }
  0xcc   :  { %v220_v61 = vpop.f32.mrf.mxu0 }
  0xcd   :  { %v221_v62 = vadd.f32 %v1665_v58, %v220_v61  ;;  %v363_v22 = vmax.f32 %v229_v12, 0.0 }
  0xce   :  { %v1249_v63 = vpop.f32.mrf.mxu0 }
  0xcf   :  { %v361_v1 = vmax.f32 %v221_v62, 0.0  ;;  %v242_v4 = vadd.f32 %v1249_v63, %v1665_v58  ;;  %v399_v35 = vmax.f32 %v362_v28, %v363_v22  ;;  %v1383_v28 = vld [vmem:[%s1945_s4 + $0x18] sm:$0xff]  }
  0xd0   :  { %v233_v2 = vpop.f32.mrf.mxu0  ;;  %1279 = vmatprep.subr.bf16.mxu1 %v1383_v28 }
  0xd1   :  { %v1669_v3 = vmax.f32 %v360_v0, %v361_v1  ;;  %v366_v8 = vmax.f32 %v242_v4, 0.0  ;;  %v234_v19 = vadd.f32 %v1665_v58, %v233_v2  ;;  %1280 = vmatpush3.bf16.msra.mxu1 %v1383_v28 }
  0xd2   :  { %v1250_v5 = vpop.f32.mrf.mxu0 }
  0xd3   :  { %v245_v6 = vadd.f32 %v1250_v5, %v1665_v58  ;;  %v364_v30 = vmax.f32 %v234_v19, 0.0 }
  0xd4   :  { %v236_v7 = vpop.f32.mrf.mxu0 }
  0xd5   :  { %v367_v9 = vmax.f32 %v245_v6, 0.0  ;;  %v237_v15 = vadd.f32 %v1665_v58, %v236_v7 }
  0xd6   :  { %v1253_v10 = vpop.f32.mrf.mxu0 }
  0xd7   :  { %v1673_v11 = vmax.f32 %v366_v8, %v367_v9  ;;  %v258_v16 = vadd.f32 %v1253_v10, %v1665_v58  ;;  %v365_v24 = vmax.f32 %v237_v15, 0.0 }
  0xd8   :  { %v249_v13 = vpop.f32.mrf.mxu0 }
  0xd9   :  { %v398_v14 = vmax.f32 %v1669_v3, %v1673_v11  ;;  %v250_v20 = vadd.f32 %v1665_v58, %v249_v13  ;;  %v370_v25 = vmax.f32 %v258_v16, 0.0  ;;  %v402_v36 = vmax.f32 %v364_v30, %v365_v24 }
  0xda   :  { %v1254_v18 = vpop.f32.mrf.mxu0 }
  0xdb   :  { %v261_v21 = vadd.f32 %v1254_v18, %v1665_v58  ;;  %v368_v31 = vmax.f32 %v250_v20, 0.0 }
  0xdc   :  { %v252_v23 = vpop.f32.mrf.mxu0 }
  0xdd   :  { %v371_v26 = vmax.f32 %v261_v21, 0.0  ;;  %v253_v27 = vadd.f32 %v1665_v58, %v252_v23 }
  0xde   :  { %v1257_v29 = vpop.f32.mrf.mxu0 }
  0xdf   :  { %v403_v32 = vmax.f32 %v370_v25, %v371_v26  ;;  %v369_v33 = vmax.f32 %v253_v27, 0.0  ;;  %v274_v55 = vadd.f32 %v1257_v29, %v1665_v58 }
  0xe0   :  { %v265_v34 = vpop.f32.mrf.mxu0 }
  0xe1   :  { %v400_v37 = vmax.f32 %v368_v31, %v369_v33  ;;  %v404_v40 = vmax.f32 %v402_v36, %v403_v32  ;;  %v266_v56 = vadd.f32 %v1665_v58, %v265_v34  ;;  %v374_v8 = vmax.f32 %v274_v55, 0.0  ;;  %v1384_v31 = vld [vmem:[%s1945_s4 + $0x10] sm:$0xff]   ;;  %v1385_v34 = vld [vmem:[%s1945_s4 + $0x8] sm:$0xff]  }
  0xe2   :  { %v1258_v38 = vpop.f32.mrf.mxu0  ;;  %1281 = vmatprep.subr.bf16.mxu1 %v1384_v31 }
  0xe3   :  { %v1685_v39 = vmax.f32 %v399_v35, %v400_v37  ;;  %v277_v49 = vadd.f32 %v1258_v38, %v1665_v58  ;;  %v372_v9 = vmax.f32 %v266_v56, 0.0  ;;  %1282 = vmatpush3.bf16.msra.mxu1 %v1384_v31 }
  0xe4   :  { %v268_v41 = vpop.f32.mrf.mxu0  ;;  %1283 = vmatprep.subr.bf16.mxu1 %v1385_v34 }
  0xe5   :  { %v1352_v42 = vpack.i.bf16 %v404_v40, %v1685_v39  ;;  %v269_v50 = vadd.f32 %v1665_v58, %v268_v41  ;;  %v375_v63 = vmax.f32 %v277_v49, 0.0 }
  0xe6   :  { %v1261_v43 = vpop.f32.mrf.mxu0 }
  0xe7   :  { %1353 = vrot.lane.b32.xlu0 %v1352_v42, %s1445_s0  ;;  %v290_v51 = vadd.f32 %v1261_v43, %v1665_v58  ;;  %v373_v0 = vmax.f32 %v269_v50, 0.0  ;;  %v408_v19 = vmax.f32 %v374_v8, %v375_v63  ;;  %1284 = vmatpush3.bf16.msra.mxu1 %v1385_v34 }
  0xe8   :  { %v281_v44 = vpop.f32.mrf.mxu0 }
  0xe9   :  { %v282_v57 = vadd.f32 %v1665_v58, %v281_v44  ;;  %v378_v1 = vmax.f32 %v290_v51, 0.0  ;;  %v405_v20 = vmax.f32 %v372_v9, %v373_v0 }
  0xea   :  { %v1262_v45 = vpop.f32.mrf.mxu0 }
  0xeb   :  { %v293_v48 = vadd.f32 %v1262_v45, %v1665_v58  ;;  %v376_v10 = vmax.f32 %v282_v57, 0.0 }
  0xec   :  { %v284_v46 = vpop.f32.mrf.mxu0 }
  0xed   :  { %v285_v53 = vadd.f32 %v1665_v58, %v284_v46  ;;  %v379_v60 = vmax.f32 %v293_v48, 0.0 }
  0xee   :  { %v1265_v47 = vpop.f32.mrf.mxu0 }
  0xef   :  { %v306_v54 = vadd.f32 %v1265_v47, %v1665_v58  ;;  %v377_v4 = vmax.f32 %v285_v53, 0.0  ;;  %v406_v13 = vmax.f32 %v378_v1, %v379_v60  ;;  %v1386_v53 = vld [vmem:[%s1945_s4] sm:$0xff]  }
  0xf0   :  { %v297_v52 = vpop.f32.mrf.mxu0  ;;  %1285 = vmatprep.subr.bf16.mxu1 %v1386_v53 }
  0xf1   :  { %v298_v61 = vadd.f32 %v1665_v58, %v297_v52  ;;  %v382_v5 = vmax.f32 %v306_v54, 0.0  ;;  %v411_v21 = vmax.f32 %v376_v10, %v377_v4  ;;  %v1701_v24 = vmax.f32 %v405_v20, %v406_v13  ;;  %1286 = vmatpush3.bf16.msra.mxu1 %v1386_v53  ;;  %v1393_v53 = vld [vmem:[%s1946_s6 + $0x8] sm:$0xff]  }
  0xf2   :  { %v1266_v59 = vpop.f32.mrf.mxu0 }
  0xf3   :  { %v309_v62 = vadd.f32 %v1266_v59, %v1665_v58  ;;  %v380_v15 = vmax.f32 %v298_v61, 0.0 }
  0xf4   :  { %v300_v2 = vpop.f32.mrf.mxu0 }
  0xf5   :  { %v383_v6 = vmax.f32 %v309_v62, 0.0  ;;  %v301_v7 = vadd.f32 %v1665_v58, %v300_v2 }
  0xf6   :  { %v1269_v12 = vpop.f32.mrf.mxu0 }
  0xf7   :  { %v412_v16 = vmax.f32 %v382_v5, %v383_v6  ;;  %v381_v17 = vmax.f32 %v301_v7, 0.0  ;;  %v322_v46 = vadd.f32 %v1269_v12, %v1665_v58 }
  0xf8   :  { %v313_v18 = vpop.f32.mrf.mxu0 }
  0xf9   :  { %v409_v22 = vmax.f32 %v380_v15, %v381_v17  ;;  %v413_v26 = vmax.f32 %v411_v21, %v412_v16  ;;  %v314_v47 = vadd.f32 %v1665_v58, %v313_v18  ;;  %v386_v63 = vmax.f32 %v322_v46, 0.0 }
  0xfa   :  { %v1270_v23 = vpop.f32.mrf.mxu0 }
  0xfb   :  { %v1703_v25 = vmax.f32 %v408_v19, %v409_v22  ;;  %v325_v40 = vadd.f32 %v1270_v23, %v1665_v58  ;;  %v384_v0 = vmax.f32 %v314_v47, 0.0 }
  0xfc   :  { %v316_v27 = vpop.f32.mrf.mxu0 }
  0xfd   :  { %v1362_v29 = vpack.i.bf16 %v413_v26, %v1703_v25  ;;  %v1357_v30 = vpack.i.bf16 %v1703_v25, %v1701_v24  ;;  %v317_v41 = vadd.f32 %v1665_v58, %v316_v27  ;;  %v387_v54 = vmax.f32 %v325_v40, 0.0 }
  0xfe   :  { %v1273_v32 = vpop.f32.mrf.mxu0 }
  0xff   :  { %1363 = vrot.lane.b32.xlu1 %v1362_v29, %s1445_s0  ;;  %1358 = vrot.lane.b32.xlu0 %v1357_v30, %s1446_s17  ;;  %v338_v42 = vadd.f32 %v1273_v32, %v1665_v58  ;;  %v385_v55 = vmax.f32 %v317_v41, 0.0  ;;  %v417_v7 = vmax.f32 %v386_v63, %v387_v54  ;;  %v1146_v54 = vld [vmem:[%s1947_s5] ss:$0 sm:$0xff]  ;;  %s1450_s5 = smov 64  }
 0x100   :  { %v329_v33 = vpop.f32.mrf.mxu0 }
 0x101   :  { %v330_v48 = vadd.f32 %v1665_v58, %v329_v33  ;;  %v390_v56 = vmax.f32 %v338_v42, 0.0  ;;  %v414_v8 = vmax.f32 %v384_v0, %v385_v55  ;;  %v1799_v0 = vld [vmem:[%s1948_s1] sm:$0xff] }
 0x102   :  { %v1274_v35 = vpop.f32.mrf.mxu0 }
 0x103   :  { %1368 = vrot.lane.b32.xlu1 %v1362_v29, %s1447_s20  ;;  %v341_v38 = vadd.f32 %v1274_v35, %v1665_v58  ;;  %v388_v1 = vmax.f32 %v330_v48, 0.0  ;;  %v1448_v48 = vmov 0.0  }
 0x104   :  { %v332_v36 = vpop.f32.mrf.mxu0  ;;  %1291 = vmatprep.subr.bf16.mxu1 %v1448_v48 }
 0x105   :  { %v333_v44 = vadd.f32 %v1665_v58, %v332_v36  ;;  %v391_v50 = vmax.f32 %v341_v38, 0.0 }
 0x106   :  { %v1277_v37 = vpop.f32.mrf.mxu0 }
 0x107   :  { %v354_v45 = vadd.f32 %v1277_v37, %v1665_v58  ;;  %v389_v59 = vmax.f32 %v333_v44, 0.0  ;;  %v415_v2 = vmax.f32 %v390_v56, %v391_v50  ;;  %v1390_v50 = vld [vmem:[%s1946_s6 + $0x20] sm:$0xff]  }
 0x108   :  { %v345_v43 = vpop.f32.mrf.mxu0 }
 0x109   :  { %v346_v51 = vadd.f32 %v1665_v58, %v345_v43  ;;  %v394_v60 = vmax.f32 %v354_v45, 0.0  ;;  %v420_v9 = vmax.f32 %v388_v1, %v389_v59  ;;  %v416_v12 = vmax.f32 %v414_v8, %v415_v2  ;;  %v1395_v2 = vld [vmem:[%s1949_s8 + $0x70] ss:$8 sps:$4 sm:$0xff]   ;;  %v1398_v8 = vld [vmem:[%s1949_s8 + $0x60] ss:$8 sps:$4 sm:$0xff]  }
 0x10a   :  { %v1278_v49 = vpop.f32.mrf.mxu0 }
 0x10b   :  { %v357_v52 = vadd.f32 %v1278_v49, %v1665_v58  ;;  %v392_v4 = vmax.f32 %v346_v51, 0.0  ;;  %v1389_v49 = vld [vmem:[%s1946_s6 + $0x28] sm:$0xff]   ;;  %v1391_v51 = vld [vmem:[%s1946_s6 + $0x18] sm:$0xff]  }
 0x10c   :  { %v348_v57 = vpop.f32.mrf.mxu0 }
 0x10d   :  { %v395_v61 = vmax.f32 %v357_v52, 0.0  ;;  %v349_v62 = vadd.f32 %v1665_v58, %v348_v57  ;;  %v1392_v52 = vld [vmem:[%s1946_s6 + $0x10] sm:$0xff]   ;;  %v1394_v57 = vld [vmem:[%s1946_s6] sm:$0xff]  }
 0x10f   :  { %v421_v5 = vmax.f32 %v394_v60, %v395_v61  ;;  %v393_v6 = vmax.f32 %v349_v62, 0.0 }
 0x111   :  { %v418_v10 = vmax.f32 %v392_v4, %v393_v6  ;;  %v422_v13 = vmax.f32 %v420_v9, %v421_v5  ;;  %v1397_v4 = vld [vmem:[%s1949_s8 + $0x74] ss:$8 sps:$4 sm:$0xff]   ;;  %v1400_v5 = vld [vmem:[%s1949_s8 + $0x64] ss:$8 sps:$4 sm:$0xff]  }
 0x112   :  { %827 = vmatprep.subr.bf16.mxu0 %v1397_v4  ;;  %v1403_v9 = vld [vmem:[%s1949_s8 + $0x54] ss:$8 sps:$4 sm:$0xff]  }
 0x113   :  { %v419_v15 = vmax.f32 %v417_v7, %v418_v10  ;;  %828 = vmatpush1.bf16.msra.mxu0 %v1395_v2 }
 0x114   :  { %829 = vmatprep.subr.bf16.mxu0 %v1400_v5 }
 0x115   :  { %v1377_v16 = vpack.i.bf16 %v422_v13, %v419_v15  ;;  %v1372_v17 = vpack.i.bf16 %v419_v15, %v416_v12  ;;  %v1401_v12 = vld [vmem:[%s1949_s8 + $0x50] ss:$8 sps:$4 sm:$0xff]   ;;  %v1406_v13 = vld [vmem:[%s1949_s8 + $0x44] ss:$8 sps:$4 sm:$0xff]   ;;  %v1404_v15 = vld [vmem:[%s1949_s8 + $0x40] ss:$8 sps:$4 sm:$0xff]  }
 0x117   :  { %1378 = vrot.lane.b32.xlu1 %v1377_v16, %s1447_s20  ;;  %1373 = vrot.lane.b32.xlu0 %v1372_v17, %s1446_s17  ;;  %v1409_v16 = vld [vmem:[%s1949_s8 + $0x34] ss:$8 sps:$4 sm:$0xff]   ;;  %v1407_v17 = vld [vmem:[%s1949_s8 + $0x30] ss:$8 sps:$4 sm:$0xff]  }
 0x118   :  { %830 = vmatpush1.bf16.msra.mxu0 %v1398_v8 }
 0x119   :  { %831 = vmatprep.subr.bf16.mxu0 %v1403_v9  ;;  %v1424_v9 = vld [vmem:[%s1953_s12 + $0x30] sm:$0xff]  }
 0x11c   :  { %832 = vmatpush1.bf16.msra.mxu0 %v1401_v12 }
 0x11d   :  { %833 = vmatprep.subr.bf16.mxu0 %v1406_v13 }
 0x120   :  { %834 = vmatpush1.bf16.msra.mxu0 %v1404_v15 }
 0x121   :  { %835 = vmatprep.subr.bf16.mxu0 %v1409_v16 }
 0x124   :  { %836 = vmatpush1.bf16.msra.mxu0 %v1407_v17  ;;  %v1426_v17 = vld [vmem:[%s1953_s12 + $0x20] sm:$0xff]  }
 0x159   :  { %v1354_v58 = vpop.permute.xlu0 %1353 }
 0x15a   :  { %v1356_v20 = vunpack.i.h.bf16 %v1354_v58  ;;  %v1355_v21 = vunpack.i.l.bf16 %v1354_v58  ;;  %v1412_v58 = vld [vmem:[%s1949_s8 + $0x24] ss:$8 sps:$4 sm:$0xff]  }
 0x15b   :  { %837 = vmatprep.subr.bf16.mxu0 %v1412_v58  ;;  %v1427_v58 = vld [vmem:[%s1953_s12 + $0x18] sm:$0xff]  }
 0x15c   :  { %v452_v27 = vsel %vm435_vm2, %v1685_v39, %v1356_v20  ;;  %v436_v28 = vsel %vm435_vm2, %v398_v14, %v1355_v21  ;;  %v1413_v20 = vld [vmem:[%s1949_s8 + $0x10] ss:$8 sps:$4 sm:$0xff]   ;;  %v1418_v21 = vld [vmem:[%s1949_s8 + $0x4] ss:$8 sps:$4 sm:$0xff]  }
 0x171   :  { %v1364_v18 = vpop.permute.xlu1 %1363  ;;  %v1359_v19 = vpop.permute.xlu0 %1358 }
 0x172   :  { %v1361_v22 = vunpack.i.h.bf16 %v1359_v19  ;;  %v1360_v23 = vunpack.i.l.bf16 %v1359_v19  ;;  %v1366_v39 = vunpack.i.h.bf16 %v1364_v18  ;;  %v1365_v36 = vunpack.i.l.bf16 %v1364_v18  ;;  %v1410_v18 = vld [vmem:[%s1949_s8 + $0x20] ss:$8 sps:$4 sm:$0xff]   ;;  %v1415_v19 = vld [vmem:[%s1949_s8 + $0x14] ss:$8 sps:$4 sm:$0xff]  }
 0x173   :  { %838 = vmatpush1.bf16.msra.mxu0 %v1410_v18  ;;  %v1428_v18 = vld [vmem:[%s1953_s12 + $0x10] sm:$0xff]  }
 0x174   :  { %v438_v31 = vsel %vm437_vm3, %v436_v28, %v1360_v23  ;;  %v453_v32 = vsel %vm437_vm3, %v452_v27, %v1361_v22  ;;  %v479_v41 = vsel %vm435_vm2, %v1703_v25, %v1366_v39  ;;  %v466_v42 = vsel %vm435_vm2, %v1701_v24, %v1365_v36  ;;  %v1387_v25 = vld [vmem:[%s1946_s6 + $0x38] sm:$0xff]   ;;  %v1388_v24 = vld [vmem:[%s1946_s6 + $0x30] sm:$0xff]   ;;  %839 = vmatprep.subr.bf16.mxu0 %v1415_v19  ;;  %v1416_v22 = vld [vmem:[%s1949_s8] ss:$8 sps:$4 sm:$0xff]  }
 0x175   :  { %v1369_v26 = vpop.permute.xlu1 %1368  ;;  %v1429_v19 = vld [vmem:[%s1953_s12 + $0x8] sm:$0xff]  }
 0x176   :  { %v1371_v29 = vunpack.i.h.bf16 %v1369_v26  ;;  %v1370_v30 = vunpack.i.l.bf16 %v1369_v26 }
 0x177   :  { %840 = vmatpush1.bf16.msra.mxu0 %v1413_v20  ;;  %v1430_v20 = vld [vmem:[%s1953_s12] sm:$0xff]  }
 0x178   :  { %v440_v33 = vsel %vm439_vm4, %v438_v31, %v1370_v30  ;;  %v454_v34 = vsel %vm439_vm4, %v453_v32, %v1371_v29  ;;  %841 = vmatprep.subr.bf16.mxu0 %v1418_v21  ;;  %v1178_v21 = vld [vmem:[%s1954_s11] ss:$0 sm:$0xff] }
 0x179   :  { %v482_v35 = vpack.c.bf16 %v454_v34, %v440_v33  ;;  %v1452_v33 = vmov 0   ;;  %v1153_v34 = vld [vmem:[%s1950_s7] ss:$0 sm:$0xff] }
 0x17a   :  { %859 = vmatprep.mubr.bf16.mxu0 %v1452_v33 }
 0x17b   :  { %1287 = vmatprep.mubr.msk.bf16.mxu1 %vm523_vm5, %v482_v35  ;;  %842 = vmatpush1.bf16.msra.mxu0 %v1416_v22 }
 0x17c   :  { %1311 = vmatprep.subr.bf16.mxu0 %v1448_v48 }
 0x189   :  { %v1379_v37 = vpop.permute.xlu1 %1378  ;;  %v1374_v3 = vpop.permute.xlu0 %1373 }
 0x18a   :  { %v1381_v11 = vunpack.i.h.bf16 %v1379_v37  ;;  %v1380_v14 = vunpack.i.l.bf16 %v1379_v37  ;;  %v1376_v38 = vunpack.i.h.bf16 %v1374_v3  ;;  %v1375_v40 = vunpack.i.l.bf16 %v1374_v3 }
 0x18c   :  { %v480_v43 = vsel %vm437_vm3, %v479_v41, %v1376_v38  ;;  %v467_v44 = vsel %vm437_vm3, %v466_v42, %v1375_v40  ;;  %v737_v41 = vlaneseq }
 0x18d   :  { %v468_v45 = vsel %vm439_vm4, %v467_v44, %v1380_v14  ;;  %v481_v46 = vsel %vm439_vm4, %v480_v43, %v1381_v11  ;;  %v735_v44 = vld [vmem:[%s1951_s9] sm:$0x3] }
 0x18e   :  { %v483_v47 = vpack.c.bf16 %v481_v46, %v468_v45  ;;  %v738_v42 = vshrl.u32 %v737_v41, 7 }
 0x190   :  { %1288 = vmatmul.mubr.msk.bf16.vlgmr.msra.gmra.mxu1 %vm523_vm5, %v483_v47  ;;  %v739_v43 = vsub.s32 0, %v738_v42  ;;  %v743_v46 = vsub.s32 1, %v738_v42 }
 0x191   :  { %1292 = vmatpush3.bf16.msra.mxu1 %v1387_v25  ;;  %1307 = vmatprep.mubr.msk.bf16.mxu1 %vm1449_vm6, %v1448_v48 }
 0x192   :  { %1293 = vmatprep.subr.bf16.mxu1 %v1448_v48  ;;  %v740_v45 = vrot.slane %v735_v44, %v739_v43 }
 0x195   :  { %1294 = vmatpush3.bf16.msra.mxu1 %v1388_v24  ;;  %v744_v24 = vrot.slane %v735_v44, %v743_v46 }
 0x196   :  { %1295 = vmatprep.subr.bf16.mxu1 %v1448_v48 }
 0x199   :  { %1296 = vmatpush3.bf16.msra.mxu1 %v1389_v49 }
 0x19a   :  { %1297 = vmatprep.subr.bf16.mxu1 %v1448_v48 }
 0x19d   :  { %1298 = vmatpush3.bf16.msra.mxu1 %v1390_v50 }
 0x19e   :  { %1299 = vmatprep.subr.bf16.mxu1 %v1448_v48 }
 0x1a1   :  { %1300 = vmatpush3.bf16.msra.mxu1 %v1391_v51 }
 0x1a2   :  { %1301 = vmatprep.subr.bf16.mxu1 %v1448_v48 }
 0x1a5   :  { %1302 = vmatpush3.bf16.msra.mxu1 %v1392_v52 }
 0x1a6   :  { %1303 = vmatprep.subr.bf16.mxu1 %v1448_v48 }
 0x1a9   :  { %1304 = vmatpush3.bf16.msra.mxu1 %v1393_v53 }
 0x1aa   :  { %1305 = vmatprep.subr.bf16.mxu1 %v1448_v48 }
 0x1ad   :  { %1306 = vmatpush3.bf16.msra.mxu1 %v1394_v57 }
 0x1ae   :  { %1323 = vmatprep.subr.bf16.mxu1 %v1448_v48 }
 0x250   :  { %v1289_v55 = vpop.f32.mrf.mxu1 }
 0x251   :  { %v573_v56 = vadd.f32 %v1289_v55, %v1146_v54 }
 0x252   :  { %v564_v59 = vpop.f32.mrf.mxu1 }
 0x253   :  { %v581_v60 = vmax.f32 %v573_v56, 0.0  ;;  %v565_v61 = vadd.f32 %v1146_v54, %v564_v59 }
 0x254   :  { %v1290_v62 = vpop.f32.mrf.mxu1 }
 0x255   :  { %588 = vrot.lane.b32.xlu1 %v581_v60, %s1450_s5  ;;  %v576_v6 = vadd.f32 %v1290_v62, %v1146_v54  ;;  %v579_v23 = vmax.f32 %v565_v61, 0.0  ;;  %v1419_v60 = vld [vmem:[%s1952_s10 + $0x18] sm:$0xff]   ;;  %v1420_v61 = vld [vmem:[%s1952_s10 + $0x10] sm:$0xff]   ;;  %v1421_v62 = vld [vmem:[%s1952_s10 + $0x8] sm:$0xff]  }
 0x256   :  { %v567_v63 = vpop.f32.mrf.mxu1 }
 0x257   :  { %v568_v1 = vadd.f32 %v1146_v54, %v567_v63  ;;  %v582_v10 = vmax.f32 %v576_v6, 0.0  ;;  %v1422_v63 = vld [vmem:[%s1952_s10] sm:$0xff]  }
 0x259   :  { %v580_v7 = vmax.f32 %v568_v1, 0.0  ;;  %714 = vrot.lane.b32.xlu1 %v1799_v0, %s1450_s5 }
 0x25b   :  { %584 = vrot.lane.b32.xlu0 %v580_v7, %s1446_s17  ;;  %v1423_v7 = vld [vmem:[%s1953_s12 + $0x38] sm:$0xff]  }
 0x25f   :  { %592 = vrot.lane.b32.xlu0 %v582_v10, %s1451_s16 }
 0x2c7   :  { %v589_v28 = vpop.permute.xlu1 %588 }
 0x2cb   :  { %v715_v37 = vpop.permute.xlu1 %714 }
 0x2cd   :  { %v585_v26 = vpop.permute.xlu0 %584 }
 0x2ce   :  { %v595_v27 = vsel %vm437_vm3, %v579_v23, %v585_v26 }
 0x2cf   :  { %v596_v30 = vsel %vm523_vm5, %v595_v27, %v589_v28 }
 0x2d1   :  { %v593_v29 = vpop.permute.xlu0 %592 }
 0x2d2   :  { %v598_v31 = vsel %vm597_vm7, %v596_v30, %v593_v29 }
 0x2d3   :  { %v599_v32 = vpack.c.bf16 %v598_v31, %v598_v31  ;;  %v1184_v31 = vld [vmem:[%s1955_s13] ss:$0 sm:$0xff] }
 0x2d5   :  { %1308 = vmatmul.mubr.bf16.vlgmr.msra.gmra.mxu1 %v599_v32 }
 0x2d6   :  { %1339 = vmatprep.mubr.msk.bf16.mxu1 %vm1449_vm6, %v1448_v48  ;;  %1324 = vmatpush3.bf16.msra.mxu1 %v1423_v7 }
 0x2d7   :  { %1325 = vmatprep.subr.bf16.mxu1 %v1448_v48 }
 0x2da   :  { %1326 = vmatpush3.bf16.msra.mxu1 %v1424_v9 }
 0x2db   :  { %1327 = vmatprep.subr.bf16.mxu1 %v1448_v48 }
 0x395   :  { %v705_v35 = vpop.f32.mrf.mxu1 }
 0x396   :  { %v706_v39 = vadd.f32 %v1153_v34, %v705_v35 }
 0x397   :  { %v1309_v36 = vpop.f32.mrf.mxu1 }
 0x398   :  { %v711_v3 = vmax.f32 %v706_v39, 0.0 }
 0x399   :  { %v708_v11 = vpop.f32.mrf.mxu1 }
 0x39a   :  { %v717_v14 = vsel %vm523_vm5, %v711_v3, %v715_v37 }
 0x39b   :  { %v718_v38 = vpack.c.bf16 %v717_v14, %v717_v14  ;;  %v1310_v40 = vpop.f32.mrf.mxu1 }
 0x39d   :  { %860 = vmatmul.mubr.bf16.vlgmr.msra.gmra.mxu0 %v718_v38 }
 0x39e   :  { %1319 = vmatprep.mubr.msk.bf16.mxu0 %vm1449_vm6, %v1448_v48  ;;  %1312 = vmatpush3.bf16.msra.mxu0 %v1419_v60 }
 0x39f   :  { %1313 = vmatprep.subr.bf16.mxu0 %v1448_v48 }
 0x3a2   :  { %1314 = vmatpush3.bf16.msra.mxu0 %v1420_v61 }
 0x3a3   :  { %1315 = vmatprep.subr.bf16.mxu0 %v1448_v48 }
 0x3a6   :  { %1316 = vmatpush3.bf16.msra.mxu0 %v1421_v62 }
 0x3a7   :  { %1317 = vmatprep.subr.bf16.mxu0 %v1448_v48 }
 0x3aa   :  { %1318 = vmatpush3.bf16.msra.mxu0 %v1422_v63 }
 0x45d   :  { %v861_v47 = vpop.f32.mrf.mxu0 }
 0x45e   :  { %v862_v25 = vadd.f32 %v861_v47, %v740_v45 }
 0x45f   :  { %v863_v49 = vpop.f32.mrf.mxu0 }
 0x460   :  { %v868_v50 = vmul.f32 0.5, %v862_v25  ;;  %v864_v52 = vadd.f32 %v863_v49, %v744_v24 }
 0x461   :  { %v865_v51 = vpop.f32.mrf.mxu0 }
 0x462   :  { %1431 = vtanh.f32 %v868_v50  ;;  %v873_v1 = vmul.f32 0.5, %v864_v52 }
 0x463   :  { %v866_v53 = vpop.f32.mrf.mxu0  ;;  %1433 = vtanh.f32 %v864_v52 }
 0x464   :  { %1435 = vtanh.f32 %v873_v1 }
 0x46f   :  { %v1432_v54 = vpop.eup %1431 }
 0x470   :  { %v870_v55 = vmul.f32 0.5, %v1432_v54  ;;  %v1434_v57 = vpop.eup %1433 }
 0x471   :  { %v1436_v6 = vpop.eup %1435 }
 0x472   :  { %v871_v56 = vadd.f32 0.5, %v870_v55  ;;  %v875_v8 = vmul.f32 0.5, %v1436_v6 }
 0x474   :  { %v878_v59 = vmul.f32 %v1434_v57, %v871_v56  ;;  %v877_v2 = vmul.f32 %v871_v56, %v1799_v0  ;;  %v876_v10 = vadd.f32 0.5, %v875_v8  ;;  %v1425_v0 = vld [vmem:[%s1953_s12 + $0x28] sm:$0xff]  }
 0x475   :  { %1328 = vmatpush3.bf16.msra.mxu1 %v1425_v0 }
 0x476   :  { %880 = vrot.lane.b32.xlu0 %v878_v59, %s1450_s5  ;;  %1329 = vmatprep.subr.bf16.mxu1 %v1448_v48 }
 0x479   :  { %1330 = vmatpush3.bf16.msra.mxu1 %v1426_v17 }
 0x47a   :  { %1331 = vmatprep.subr.bf16.mxu1 %v1448_v48 }
 0x47d   :  { %1332 = vmatpush3.bf16.msra.mxu1 %v1427_v58 }
 0x47e   :  { %1333 = vmatprep.subr.bf16.mxu1 %v1448_v48 }
 0x481   :  { %1334 = vmatpush3.bf16.msra.mxu1 %v1428_v18 }
 0x482   :  { %1335 = vmatprep.subr.bf16.mxu1 %v1448_v48 }
 0x485   :  { %1336 = vmatpush3.bf16.msra.mxu1 %v1429_v19 }
 0x486   :  { %1337 = vmatprep.subr.bf16.mxu1 %v1448_v48  ;;  %v1096_v48 = vand.u32 127, %v737_v41 }
 0x488   :  { %vm1097_vm8 = vcmp.lt.s32.totalorder %v1096_v48, 7  ;;  %vm1113_vm10 = vcmp.eq.s32.totalorder %v1096_v48, 7 }
 0x489   :  { %1338 = vmatpush3.bf16.msra.mxu1 %v1430_v20 }
 0x4e8   :  { %v881_v4 = vpop.permute.xlu0 %880 }
 0x4e9   :  { %v1884_v5 = vadd.f32 %v881_v4, %v877_v2 }
 0x4eb   :  { %1437 = vtanh.f32 %v1884_v5 }
 0x4f8   :  { %v1438_v12 = vpop.eup %1437 }
 0x4f9   :  { %v885_v13 = vmul.f32 %v1438_v12, %v876_v10 }
 0x4fb   :  { %v896_v15 = vpack.c.bf16 %v885_v13, %v885_v13 }
 0x4fd   :  { %913 = vrot.lane.b32.xlu1 %v896_v15, %s1450_s5 }
 0x56f   :  { %v914_v16 = vpop.permute.xlu1 %913 }
 0x570   :  { %1320 = vmatmul.mubr.msk.bf16.vlgmr.msra.gmra.mxu0 %vm523_vm5, %v914_v16 }
 0x630   :  { %v976_v22 = vpop.f32.mrf.mxu0 }
 0x631   :  { %v977_v23 = vadd.f32 %v1178_v21, %v976_v22 }
 0x632   :  { %v1321_v26 = vpop.f32.mrf.mxu0 }
 0x633   :  { %1439 = vtanh.f32 %v977_v23 }
 0x634   :  { %v979_v27 = vpop.f32.mrf.mxu0 }
 0x636   :  { %v1322_v28 = vpop.f32.mrf.mxu0 }
 0x640   :  { %v1440_v29 = vpop.eup %1439 }
 0x641   :  { %v983_v30 = vpack.c.bf16 %v1440_v29, %v1440_v29 }
 0x643   :  { %1340 = vmatmul.mubr.bf16.vlgmr.msra.gmra.mxu1 %v983_v30 }
 0x703   :  { %v1089_v32 = vpop.f32.mrf.mxu1 }
 0x704   :  { %v1090_v33 = vadd.f32 %v1184_v31, %v1089_v32 }
 0x705   :  { %v1341_v34 = vpop.f32.mrf.mxu1 }
 0x706   :  { %v1098_v35 = vsel %vm1097_vm8, %v1090_v33, -inf  ;;  %v1114_v25 = vsel %vm1113_vm10, %v1090_v33, 0.0 }
 0x707   :  { %v1092_v39 = vpop.f32.mrf.mxu1  ;;  %v1100_v36 = vsel %vm1099_vm9, %v1098_v35, -inf }
 0x708   :  { %1101 = vmax.xlane.f32.xlu0 %v1100_v36 }
 0x709   :  { %v1342_v37 = vpop.f32.mrf.mxu1 }
 0x71e   :  { %887 = vrot.lane.b32.xlu0 %v885_v13, %s1450_s5 }
 0x791   :  { %v1102_v3 = vpop.xlane.xlu0 %1101 }
 0x792   :  { %v1103_v11 = vsub.f32 %v1090_v33, %v1102_v3 }
 0x794   :  { %v1104_v14 = vmul.f32 1.442695, %v1103_v11 }
 0x795   :  { %v888_v38 = vpop.permute.xlu0 %887 }
 0x796   :  { %1441 = vpow2.f32 %v1104_v14  ;;  %v890_v40 = vsel %vm523_vm5, %v888_v38, %v1884_v5 }
 0x797   :  { %895 = vst [vmem:[%s1956_s15] sm:$0xff] %v890_v40 }
 0x7a3   :  { %v1442_v41 = vpop.eup %1441 }
 0x7a4   :  { %v1106_v42 = vsel %vm1097_vm8, %v1442_v41, 0.0 }
 0x7a5   :  { %v1107_v43 = vsel %vm1099_vm9, %v1106_v42, 0.0 }
 0x7a6   :  { %1108 = vadd.xlane.f32.xlu1 %v1107_v43 }
 0x82f   :  { %v1109_v44 = vpop.xlane.xlu1 %1108 }
 0x830   :  { %1443 = vlog2.f32 %v1109_v44 }
 0x83d   :  { %v1444_v45 = vpop.eup %1443 }
 0x83e   :  { %v1111_v46 = vmul.f32 0.6931472, %v1444_v45 }
 0x840   :  { %v1112_v47 = vsub.f32 %v1103_v11, %v1111_v46 }
 0x842   :  { %v1115_v24 = vsel %vm1097_vm8, %v1112_v47, %v1114_v25 }
 0x843   :  { %v1116_v49 = vsel %vm1099_vm9, %v1115_v24, 0.0 }
 0x844   :  { %1117 = vst [vmem:[%s1957_s14] sm:$0xff] %v1116_v49 }

</bundles_post_ra>
